<compile_context>
chip_gen: v7x
topology: tpu7x:2x2x1
jax: 0.10.0
libtpu: 0.0.40
codegen_flags: <defaults>
</compile_context>

<pallas_src>
import functools
import math

import jax
import jax.numpy as jnp
from jax.experimental import pallas as pl
from jax.experimental.pallas import tpu as pltpu


# ---------------------------------------------------------------------------
# Fused GhostBottleneck kernel (one grid step per batch element)
# ---------------------------------------------------------------------------
def _ghost_bottleneck_kernel(
    mask_ref, x_ref,
    # per DynamicConv stage: rwb = [routing_W^T ; routing_b] (Cin+1, E),
    #                        w   = experts with BN scale folded in,
    #                        b   = folded BN bias (Cout, 1)
    g1p_rwb, g1p_w, g1p_b,     # ghost1.primary  (1x1, ReLU)
    g1c_rwb, g1c_w, g1c_b,     # ghost1.cheap    (dw3x3, ReLU)
    g2p_rwb, g2p_w, g2p_b,     # ghost2.primary  (1x1, no act)
    g2c_rwb, g2c_w, g2c_b,     # ghost2.cheap    (dw3x3, no act)
    o_ref, *, H, W, E, mid_chs, out_chs):
  HW = H * W
  inv_hw = 1.0 / float(HW)
  f32 = jnp.float32

  mask = mask_ref[...].astype(f32)        # (9, HW) grid-invariant border masks
  x = x_ref[0].astype(f32)                # (C_in, HW): spatial on the 128-wide lane axis

  def routing(parts, rwb_ref):
    # sigmoid(W_r @ mean(x) + b_r) without the MXU: the routing matrix is stored
    # transposed (Cin, E), so the contraction is a (Cin,1)-broadcast multiply
    # followed by a sublane (XLU) reduce.  sigmoid sits on the free EUP slot.
    # Weights are split along Cin so the GhostModule concat never materializes
    # (mean of concat == concat of means).
    rwb = rwb_ref[...].astype(f32)        # (sum Ci + 1, E)
    cin = sum(p.shape[0] for p in parts)
    logits = rwb[cin:cin + 1, :]          # routing bias row (1, E)
    off = 0
    for p in parts:
      c = p.shape[0]
      pooled = jnp.sum(p, axis=1, keepdims=True) * inv_hw          # (c, 1) lane reduce
      logits = logits + jnp.sum(rwb[off:off + c, :] * pooled,
                                axis=0, keepdims=True)             # (1, E)
      off += c
    return jax.nn.sigmoid(logits)         # (1, E) routing weights

  def combine(r, w_ref):
    # wc = sum_e r_e * W_e  (E=4, static; tiny tiles -> short unrolled VPU loop)
    w = w_ref[...].astype(f32)            # (E, Cout, K), BN scale pre-folded
    wc = r[0:1, 0:1] * w[0]
    for e in range(1, E):
      wc = wc + r[0:1, e:e + 1] * w[e]
    return wc                             # (Cout, K)

  def dyn_pointwise(parts, rwb_ref, w_ref, b_ref, relu):
    # DynamicConv(k=1) + folded BN + optional ReLU as a VPU broadcast-FMA over Cin:
    # (Cout,1) column x (1,HW) row per input channel.  Keeps the tiny GEMM off the
    # MXU (no push/pop latency on the serial chain at these channel counts).
    r = routing(parts, rwb_ref)
    wc = combine(r, w_ref)                # (Cout, sum Ci)
    acc = None
    off = 0
    for p in parts:
      for j in range(p.shape[0]):
        term = wc[:, off + j:off + j + 1] * p[j:j + 1, :]          # (Cout, HW)
        acc = term if acc is None else acc + term
      off += p.shape[0]
    y = acc + b_ref[...].astype(f32)      # (Cout, 1) bias broadcast over lanes
    return jnp.maximum(y, 0.0) if relu else y

  def dyn_depthwise(xin, rwb_ref, w_ref, b_ref, relu):
    # DynamicConv(k=3, groups=C) + folded BN + optional ReLU.  The 9 shifted windows
    # come from pltpu.roll along the flattened spatial (lane) axis -- XLU slot, no
    # padded tensor -- with the precomputed border masks providing SAME zero-padding.
    r = routing([xin], rwb_ref)
    wc = combine(r, w_ref)                # (C, 9) per-channel taps
    acc = None
    for dy in (-1, 0, 1):
      for dx in (-1, 0, 1):
        t = (dy + 1) * 3 + (dx + 1)
        d = dy * W + dx
        if d == 0:
          win = xin                       # center tap: no roll, no mask
        else:
          win = pltpu.roll(xin, (-d) % HW, axis=1) * mask[t:t + 1, :]
        term = win * wc[:, t:t + 1]       # (C,1) tap weight broadcast over HW
        acc = term if acc is None else acc + term
    y = acc + b_ref[...].astype(f32)
    return jnp.maximum(y, 0.0) if relu else y

  # ---- forward --------------------------------------------------------------
  x1a = dyn_pointwise([x], g1p_rwb, g1p_w, g1p_b, relu=True)
  x1b = dyn_depthwise(x1a, g1c_rwb, g1c_w, g1c_b, relu=True)[:mid_chs - x1a.shape[0]]
  # ghost2.primary consumes the *logical* concat [x1a ; x1b]: weights are split
  # along Cin instead of materializing the concat.
  x2a = dyn_pointwise([x1a, x1b], g2p_rwb, g2p_w, g2p_b, relu=False)
  x2b = dyn_depthwise(x2a, g2c_rwb, g2c_w, g2c_b, relu=False)[:out_chs - x2a.shape[0]]

  # GhostModule cat + identity shortcut fused into ONE full-block store
  # (unmasked lane/sublane-dense vst).
  y = jnp.concatenate([x2a, x2b], axis=0)          # (out_chs, HW)
  o_ref[0] = (x + y).astype(o_ref.dtype)


# ---------------------------------------------------------------------------
# Host-side helpers
# ---------------------------------------------------------------------------
def _pack_stage(p):
  """Pack raw DynamicConv+BN params into 3 kernel arrays per stage."""
  rwb = jnp.concatenate([p["rw"].T, p["rb"].T], axis=0)      # (Cin+1, E)
  w = p["w"] * p["scale"][None, :, :]                        # fold BN scale into experts
  return rwb, w, p["bias"]                                   # bias stays (Cout, 1)


def _border_masks(H, W):
  """(9, HW) float32 validity masks for the 3x3 roll-based depthwise (SAME padding)."""
  HW = H * W
  pos = jnp.arange(HW, dtype=jnp.int32)
  hh, ww = pos // W, pos % W
  rows = []
  for dy in (-1, 0, 1):
    for dx in (-1, 0, 1):
      ok = (hh + dy >= 0) & (hh + dy < H) & (ww + dx >= 0) & (ww + dx < W)
      rows.append(ok.astype(jnp.float32))
  return jnp.stack(rows, axis=0)


def ghost_bottleneck(x_nchw, params):
  """GhostBottleneck forward (stride=1, no SE, identity shortcut). NCHW in/out."""
  B, C_in, H, W = x_nchw.shape
  HW = H * W
  mid_chs = params["ghost1"]["oup"]
  out_chs = params["ghost2"]["oup"]
  E = params["ghost1"]["primary"]["rw"].shape[0]
  assert C_in == out_chs, "identity shortcut requires in_chs == out_chs (stride=1)"

  # NCHW -> (B, C, H*W): spatial onto the 128-wide lane axis (free reshape, no transpose).
  x3 = x_nchw.reshape(B, C_in, HW)
  masks = _border_masks(H, W)

  stage_arrays, stage_specs = [], []
  for st in ("ghost1", "ghost2"):
    for br in ("primary", "cheap"):
      for a in _pack_stage(params[st][br]):
        stage_arrays.append(a)
        stage_specs.append(pl.BlockSpec(
            a.shape, (lambda b: (0, 0)) if a.ndim == 2 else (lambda b: (0, 0, 0))))

  kernel = functools.partial(_ghost_bottleneck_kernel, H=H, W=W, E=E,
                             mid_chs=mid_chs, out_chs=out_chs)
  out = pl.pallas_call(
      kernel,
      out_shape=jax.ShapeDtypeStruct((B, out_chs, HW), jnp.float32),
      grid=(B,),
      in_specs=[pl.BlockSpec(masks.shape, lambda b: (0, 0)),           # grid-invariant
                pl.BlockSpec((1, C_in, HW), lambda b: (b, 0, 0))] + stage_specs,
      out_specs=pl.BlockSpec((1, out_chs, HW), lambda b: (b, 0, 0)),
      compiler_params=pltpu.CompilerParams(
          dimension_semantics=("parallel",)),   # B=2 -> both v7x TCs get one image
  )(masks, x3, *stage_arrays)
  return out.reshape(B, out_chs, H, W)


# ---------------------------------------------------------------------------
# Pure-JAX reference (validation only; runs through plain XLA)
# ---------------------------------------------------------------------------
def ghost_bottleneck_reference(x_nchw, params):
  def dyn_pw(x, p, relu):
    pooled = x.mean(axis=(2, 3))                               # (B, Cin)
    r = jax.nn.sigmoid(pooled @ p["rw"].T + p["rb"][:, 0])     # (B, E)
    wc = jnp.einsum("be,eoc->boc", r, p["w"])                  # (B, Cout, Cin)
    y = jnp.einsum("boc,bchw->bohw", wc, x)
    y = y * p["scale"][:, 0][None, :, None, None] + p["bias"][:, 0][None, :, None, None]
    return jnp.maximum(y, 0.0) if relu else y

  def dyn_dw(x, p, relu):
    B, C, H, W = x.shape
    pooled = x.mean(axis=(2, 3))
    r = jax.nn.sigmoid(pooled @ p["rw"].T + p["rb"][:, 0])
    wc = jnp.einsum("be,ect->bct", r, p["w"])                  # (B, C, 9)
    xp = jnp.pad(x, ((0, 0), (0, 0), (1, 1), (1, 1)))
    y = jnp.zeros_like(x)
    for ky in range(3):
      for kx in range(3):
        t = ky * 3 + kx
        y = y + xp[:, :, ky:ky + H, kx:kx + W] * wc[:, :, t][:, :, None, None]
    y = y * p["scale"][:, 0][None, :, None, None] + p["bias"][:, 0][None, :, None, None]
    return jnp.maximum(y, 0.0) if relu else y

  def ghost(x, gp, act):
    x1 = dyn_pw(x, gp["primary"], act)
    x2 = dyn_dw(x1, gp["cheap"], act)
    return jnp.concatenate([x1, x2], axis=1)[:, :gp["oup"]]

  y = ghost(x_nchw, params["ghost1"], True)
  y = ghost(y, params["ghost2"], False)
  return x_nchw + y                                            # identity shortcut


# ---------------------------------------------------------------------------
# Deterministic parameter construction
# ---------------------------------------------------------------------------
def make_dynamic_conv_params(key, cin, cout, num_experts, depthwise):
  # routing Linear:   rw (E, Cin), rb (E, 1)
  # CondConv 1x1:     w  (E, Cout, Cin)            from (E, Cout, Cin, 1, 1)
  # CondConv dw3x3:   w  (E, C, 9), tap = 3*ky+kx  from (E, C, 1, 3, 3)
  # BatchNorm (eval): folded to scale/bias of shape (Cout, 1)
  k = jax.random.split(key, 7)
  rw = jax.random.normal(k[0], (num_experts, cin), jnp.float32) * 0.1
  rb = jax.random.normal(k[1], (num_experts, 1), jnp.float32) * 0.1
  if depthwise:
    w = jax.random.normal(k[2], (num_experts, cout, 9), jnp.float32) * 0.1
  else:
    w = jax.random.normal(k[2], (num_experts, cout, cin), jnp.float32) * 0.1
  gamma = 1.0 + 0.1 * jax.random.normal(k[3], (cout,), jnp.float32)
  beta = 0.1 * jax.random.normal(k[4], (cout,), jnp.float32)
  mean = 0.1 * jax.random.normal(k[5], (cout,), jnp.float32)
  var = jax.random.uniform(k[6], (cout,), jnp.float32, minval=0.5, maxval=1.5)
  scale = gamma / jnp.sqrt(var + 1e-5)
  bias = beta - mean * scale
  return {"rw": rw, "rb": rb, "w": w,
          "scale": scale.reshape(cout, 1), "bias": bias.reshape(cout, 1)}


if __name__ == "__main__":
  B, C_in, H, W = 2, 8, 16, 16
  mid_chs, out_chs = 16, 8        # in_chs == out_chs, stride=1 -> identity shortcut
  num_experts = 4

  key = jax.random.PRNGKey(0)
  kx, kp = jax.random.split(key)
  x = jax.random.normal(kx, (B, C_in, H, W), jnp.float32)

  init1 = math.ceil(mid_chs / 2)
  init2 = math.ceil(out_chs / 2)
  k1, k2, k3, k4 = jax.random.split(kp, 4)
  params = {
      "ghost1": {"oup": mid_chs,
                 "primary": make_dynamic_conv_params(k1, C_in, init1, num_experts, False),
                 "cheap":   make_dynamic_conv_params(k2, init1, init1, num_experts, True)},
      "ghost2": {"oup": out_chs,
                 "primary": make_dynamic_conv_params(k3, mid_chs, init2, num_experts, False),
                 "cheap":   make_dynamic_conv_params(k4, init2, init2, num_experts, True)},
  }

  out = ghost_bottleneck(x, params)
  jax.block_until_ready(out)
  assert out.shape == (B, out_chs, H, W), out.shape

  # Validate against the pure-JAX reference (reference matmuls run at XLA's default
  # f32 matmul precision; structural bugs would show up as O(0.1..1) errors).
  ref = ghost_bottleneck_reference(x, params)
  err = float(jnp.max(jnp.abs(out - ref)))
  assert err < 2e-2, f"kernel vs reference mismatch: max|diff|={err}"
  print("KERNEL_OK")
</pallas_src>

<mosaic_0001>
module attributes {stable_mosaic.version = 11 : i64} {
  func.func @_ghost_bottleneck_kernel(%arg0: i32, %arg1: memref<9x256xf32, #tpu.memory_space<vmem>>, %arg2: memref<1x8x256xf32, #tpu.memory_space<vmem>>, %arg3: memref<9x4xf32, #tpu.memory_space<vmem>>, %arg4: memref<4x8x8xf32, #tpu.memory_space<vmem>>, %arg5: memref<8x1xf32, #tpu.memory_space<vmem>>, %arg6: memref<9x4xf32, #tpu.memory_space<vmem>>, %arg7: memref<4x8x9xf32, #tpu.memory_space<vmem>>, %arg8: memref<8x1xf32, #tpu.memory_space<vmem>>, %arg9: memref<17x4xf32, #tpu.memory_space<vmem>>, %arg10: memref<4x4x16xf32, #tpu.memory_space<vmem>>, %arg11: memref<4x1xf32, #tpu.memory_space<vmem>>, %arg12: memref<5x4xf32, #tpu.memory_space<vmem>>, %arg13: memref<4x4x9xf32, #tpu.memory_space<vmem>>, %arg14: memref<4x1xf32, #tpu.memory_space<vmem>>, %arg15: memref<1x8x256xf32, #tpu.memory_space<vmem>>) attributes {dimension_semantics = [#tpu.dimension_semantics<parallel>], iteration_bounds = array<i64: 2>, scalar_prefetch = 0 : i64, scratch_operands = 0 : i64, tpu.core_type = #tpu.core_type<tc>, window_params = [{pipeline_mode = #tpu.pipeline_mode<synchronous>, transform_indices = @transform_0, window_bounds = array<i64: 9, 256>}, {transform_indices = @transform_1, window_bounds = array<i64: 1, 8, 256>}, {pipeline_mode = #tpu.pipeline_mode<synchronous>, transform_indices = @transform_2, window_bounds = array<i64: 9, 4>}, {pipeline_mode = #tpu.pipeline_mode<synchronous>, transform_indices = @transform_3, window_bounds = array<i64: 4, 8, 8>}, {pipeline_mode = #tpu.pipeline_mode<synchronous>, transform_indices = @transform_4, window_bounds = array<i64: 8, 1>}, {pipeline_mode = #tpu.pipeline_mode<synchronous>, transform_indices = @transform_5, window_bounds = array<i64: 9, 4>}, {pipeline_mode = #tpu.pipeline_mode<synchronous>, transform_indices = @transform_6, window_bounds = array<i64: 4, 8, 9>}, {pipeline_mode = #tpu.pipeline_mode<synchronous>, transform_indices = @transform_7, window_bounds = array<i64: 8, 1>}, {pipeline_mode = #tpu.pipeline_mode<synchronous>, transform_indices = @transform_8, window_bounds = array<i64: 17, 4>}, {pipeline_mode = #tpu.pipeline_mode<synchronous>, transform_indices = @transform_9, window_bounds = array<i64: 4, 4, 16>}, {pipeline_mode = #tpu.pipeline_mode<synchronous>, transform_indices = @transform_10, window_bounds = array<i64: 4, 1>}, {pipeline_mode = #tpu.pipeline_mode<synchronous>, transform_indices = @transform_11, window_bounds = array<i64: 5, 4>}, {pipeline_mode = #tpu.pipeline_mode<synchronous>, transform_indices = @transform_12, window_bounds = array<i64: 4, 4, 9>}, {pipeline_mode = #tpu.pipeline_mode<synchronous>, transform_indices = @transform_13, window_bounds = array<i64: 4, 1>}, {transform_indices = @transform_14, window_bounds = array<i64: 1, 8, 256>}]} {
    %c0 = arith.constant 0 : index
    %c0_0 = arith.constant 0 : index
    %0 = vector.load %arg1[%c0, %c0_0] : memref<9x256xf32, #tpu.memory_space<vmem>>, vector<9x256xf32>
    %c0_1 = arith.constant 0 : index
    %c0_2 = arith.constant 0 : index
    %c0_3 = arith.constant 0 : index
    %1 = vector.load %arg2[%c0_1, %c0_2, %c0_3] : memref<1x8x256xf32, #tpu.memory_space<vmem>>, vector<1x8x256xf32>
    %2 = vector.shape_cast %1 : vector<1x8x256xf32> to vector<8x256xf32>
    %c0_4 = arith.constant 0 : index
    %c0_5 = arith.constant 0 : index
    %3 = vector.load %arg3[%c0_4, %c0_5] : memref<9x4xf32, #tpu.memory_space<vmem>>, vector<9x4xf32>
    %4 = vector.extract_strided_slice %3 {offsets = [8, 0], sizes = [1, 4], strides = [1, 1]} : vector<9x4xf32> to vector<1x4xf32>
    %cst = arith.constant dense<0.000000e+00> : vector<8xf32>
    %5 = vector.multi_reduction <add>, %2, %cst [1] : vector<8x256xf32> to vector<8xf32>
    %6 = vector.shape_cast %5 : vector<8xf32> to vector<8x1xf32>
    %cst_6 = arith.constant 3.906250e-03 : f32
    %7 = vector.broadcast %cst_6 : f32 to vector<8x1xf32>
    %8 = arith.mulf %6, %7 : vector<8x1xf32>
    %9 = vector.extract_strided_slice %3 {offsets = [0, 0], sizes = [8, 4], strides = [1, 1]} : vector<9x4xf32> to vector<8x4xf32>
    %10 = vector.broadcast %8 : vector<8x1xf32> to vector<8x4xf32>
    %11 = arith.mulf %9, %10 : vector<8x4xf32>
    %cst_7 = arith.constant dense<0.000000e+00> : vector<4xf32>
    %12 = vector.multi_reduction <add>, %11, %cst_7 [0] : vector<8x4xf32> to vector<4xf32>
    %13 = vector.shape_cast %12 : vector<4xf32> to vector<1x4xf32>
    %14 = arith.addf %4, %13 : vector<1x4xf32>
    %15 = arith.negf %14 : vector<1x4xf32>
    %16 = math.exp %15 : vector<1x4xf32>
    %cst_8 = arith.constant 1.000000e+00 : f32
    %17 = vector.broadcast %cst_8 : f32 to vector<1x4xf32>
    %18 = arith.addf %17, %16 : vector<1x4xf32>
    %19 = arith.divf %17, %18 : vector<1x4xf32>
    %c0_9 = arith.constant 0 : index
    %c0_10 = arith.constant 0 : index
    %c0_11 = arith.constant 0 : index
    %20 = vector.load %arg4[%c0_9, %c0_10, %c0_11] : memref<4x8x8xf32, #tpu.memory_space<vmem>>, vector<4x8x8xf32>
    %21 = vector.extract_strided_slice %19 {offsets = [0, 0], sizes = [1, 1], strides = [1, 1]} : vector<1x4xf32> to vector<1x1xf32>
    %22 = vector.extract_strided_slice %20 {offsets = [0, 0, 0], sizes = [1, 8, 8], strides = [1, 1, 1]} : vector<4x8x8xf32> to vector<1x8x8xf32>
    %23 = vector.shape_cast %22 : vector<1x8x8xf32> to vector<8x8xf32>
    %24 = vector.broadcast %21 : vector<1x1xf32> to vector<8x8xf32>
    %25 = arith.mulf %24, %23 : vector<8x8xf32>
    %26 = vector.extract_strided_slice %19 {offsets = [0, 1], sizes = [1, 1], strides = [1, 1]} : vector<1x4xf32> to vector<1x1xf32>
    %27 = vector.extract_strided_slice %20 {offsets = [1, 0, 0], sizes = [1, 8, 8], strides = [1, 1, 1]} : vector<4x8x8xf32> to vector<1x8x8xf32>
    %28 = vector.shape_cast %27 : vector<1x8x8xf32> to vector<8x8xf32>
    %29 = vector.broadcast %26 : vector<1x1xf32> to vector<8x8xf32>
    %30 = arith.mulf %29, %28 : vector<8x8xf32>
    %31 = arith.addf %25, %30 : vector<8x8xf32>
    %32 = vector.extract_strided_slice %19 {offsets = [0, 2], sizes = [1, 1], strides = [1, 1]} : vector<1x4xf32> to vector<1x1xf32>
    %33 = vector.extract_strided_slice %20 {offsets = [2, 0, 0], sizes = [1, 8, 8], strides = [1, 1, 1]} : vector<4x8x8xf32> to vector<1x8x8xf32>
    %34 = vector.shape_cast %33 : vector<1x8x8xf32> to vector<8x8xf32>
    %35 = vector.broadcast %32 : vector<1x1xf32> to vector<8x8xf32>
    %36 = arith.mulf %35, %34 : vector<8x8xf32>
    %37 = arith.addf %31, %36 : vector<8x8xf32>
    %38 = vector.extract_strided_slice %19 {offsets = [0, 3], sizes = [1, 1], strides = [1, 1]} : vector<1x4xf32> to vector<1x1xf32>
    %39 = vector.extract_strided_slice %20 {offsets = [3, 0, 0], sizes = [1, 8, 8], strides = [1, 1, 1]} : vector<4x8x8xf32> to vector<1x8x8xf32>
    %40 = vector.shape_cast %39 : vector<1x8x8xf32> to vector<8x8xf32>
    %41 = vector.broadcast %38 : vector<1x1xf32> to vector<8x8xf32>
    %42 = arith.mulf %41, %40 : vector<8x8xf32>
    %43 = arith.addf %37, %42 : vector<8x8xf32>
    %44 = vector.extract_strided_slice %43 {offsets = [0, 0], sizes = [8, 1], strides = [1, 1]} : vector<8x8xf32> to vector<8x1xf32>
    %45 = vector.extract_strided_slice %2 {offsets = [0, 0], sizes = [1, 256], strides = [1, 1]} : vector<8x256xf32> to vector<1x256xf32>
    %46 = vector.broadcast %44 : vector<8x1xf32> to vector<8x256xf32>
    %47 = vector.broadcast %45 : vector<1x256xf32> to vector<8x256xf32>
    %48 = arith.mulf %46, %47 : vector<8x256xf32>
    %49 = vector.extract_strided_slice %43 {offsets = [0, 1], sizes = [8, 1], strides = [1, 1]} : vector<8x8xf32> to vector<8x1xf32>
    %50 = vector.extract_strided_slice %2 {offsets = [1, 0], sizes = [1, 256], strides = [1, 1]} : vector<8x256xf32> to vector<1x256xf32>
    %51 = vector.broadcast %49 : vector<8x1xf32> to vector<8x256xf32>
    %52 = vector.broadcast %50 : vector<1x256xf32> to vector<8x256xf32>
    %53 = arith.mulf %51, %52 : vector<8x256xf32>
    %54 = arith.addf %48, %53 : vector<8x256xf32>
    %55 = vector.extract_strided_slice %43 {offsets = [0, 2], sizes = [8, 1], strides = [1, 1]} : vector<8x8xf32> to vector<8x1xf32>
    %56 = vector.extract_strided_slice %2 {offsets = [2, 0], sizes = [1, 256], strides = [1, 1]} : vector<8x256xf32> to vector<1x256xf32>
    %57 = vector.broadcast %55 : vector<8x1xf32> to vector<8x256xf32>
    %58 = vector.broadcast %56 : vector<1x256xf32> to vector<8x256xf32>
    %59 = arith.mulf %57, %58 : vector<8x256xf32>
    %60 = arith.addf %54, %59 : vector<8x256xf32>
    %61 = vector.extract_strided_slice %43 {offsets = [0, 3], sizes = [8, 1], strides = [1, 1]} : vector<8x8xf32> to vector<8x1xf32>
    %62 = vector.extract_strided_slice %2 {offsets = [3, 0], sizes = [1, 256], strides = [1, 1]} : vector<8x256xf32> to vector<1x256xf32>
    %63 = vector.broadcast %61 : vector<8x1xf32> to vector<8x256xf32>
    %64 = vector.broadcast %62 : vector<1x256xf32> to vector<8x256xf32>
    %65 = arith.mulf %63, %64 : vector<8x256xf32>
    %66 = arith.addf %60, %65 : vector<8x256xf32>
    %67 = vector.extract_strided_slice %43 {offsets = [0, 4], sizes = [8, 1], strides = [1, 1]} : vector<8x8xf32> to vector<8x1xf32>
    %68 = vector.extract_strided_slice %2 {offsets = [4, 0], sizes = [1, 256], strides = [1, 1]} : vector<8x256xf32> to vector<1x256xf32>
    %69 = vector.broadcast %67 : vector<8x1xf32> to vector<8x256xf32>
    %70 = vector.broadcast %68 : vector<1x256xf32> to vector<8x256xf32>
    %71 = arith.mulf %69, %70 : vector<8x256xf32>
    %72 = arith.addf %66, %71 : vector<8x256xf32>
    %73 = vector.extract_strided_slice %43 {offsets = [0, 5], sizes = [8, 1], strides = [1, 1]} : vector<8x8xf32> to vector<8x1xf32>
    %74 = vector.extract_strided_slice %2 {offsets = [5, 0], sizes = [1, 256], strides = [1, 1]} : vector<8x256xf32> to vector<1x256xf32>
    %75 = vector.broadcast %73 : vector<8x1xf32> to vector<8x256xf32>
    %76 = vector.broadcast %74 : vector<1x256xf32> to vector<8x256xf32>
    %77 = arith.mulf %75, %76 : vector<8x256xf32>
    %78 = arith.addf %72, %77 : vector<8x256xf32>
    %79 = vector.extract_strided_slice %43 {offsets = [0, 6], sizes = [8, 1], strides = [1, 1]} : vector<8x8xf32> to vector<8x1xf32>
    %80 = vector.extract_strided_slice %2 {offsets = [6, 0], sizes = [1, 256], strides = [1, 1]} : vector<8x256xf32> to vector<1x256xf32>
    %81 = vector.broadcast %79 : vector<8x1xf32> to vector<8x256xf32>
    %82 = vector.broadcast %80 : vector<1x256xf32> to vector<8x256xf32>
    %83 = arith.mulf %81, %82 : vector<8x256xf32>
    %84 = arith.addf %78, %83 : vector<8x256xf32>
    %85 = vector.extract_strided_slice %43 {offsets = [0, 7], sizes = [8, 1], strides = [1, 1]} : vector<8x8xf32> to vector<8x1xf32>
    %86 = vector.extract_strided_slice %2 {offsets = [7, 0], sizes = [1, 256], strides = [1, 1]} : vector<8x256xf32> to vector<1x256xf32>
    %87 = vector.broadcast %85 : vector<8x1xf32> to vector<8x256xf32>
    %88 = vector.broadcast %86 : vector<1x256xf32> to vector<8x256xf32>
    %89 = arith.mulf %87, %88 : vector<8x256xf32>
    %90 = arith.addf %84, %89 : vector<8x256xf32>
    %c0_12 = arith.constant 0 : index
    %c0_13 = arith.constant 0 : index
    %91 = vector.load %arg5[%c0_12, %c0_13] : memref<8x1xf32, #tpu.memory_space<vmem>>, vector<8x1xf32>
    %92 = vector.broadcast %91 : vector<8x1xf32> to vector<8x256xf32>
    %93 = arith.addf %90, %92 : vector<8x256xf32>
    %cst_14 = arith.constant 0.000000e+00 : f32
    %94 = vector.broadcast %cst_14 : f32 to vector<8x256xf32>
    %95 = arith.maximumf %93, %94 : vector<8x256xf32>
    %c0_15 = arith.constant 0 : index
    %c0_16 = arith.constant 0 : index
    %96 = vector.load %arg6[%c0_15, %c0_16] : memref<9x4xf32, #tpu.memory_space<vmem>>, vector<9x4xf32>
    %97 = vector.extract_strided_slice %96 {offsets = [8, 0], sizes = [1, 4], strides = [1, 1]} : vector<9x4xf32> to vector<1x4xf32>
    %cst_17 = arith.constant dense<0.000000e+00> : vector<8xf32>
    %98 = vector.multi_reduction <add>, %95, %cst_17 [1] : vector<8x256xf32> to vector<8xf32>
    %99 = vector.shape_cast %98 : vector<8xf32> to vector<8x1xf32>
    %cst_18 = arith.constant 3.906250e-03 : f32
    %100 = vector.broadcast %cst_18 : f32 to vector<8x1xf32>
    %101 = arith.mulf %99, %100 : vector<8x1xf32>
    %102 = vector.extract_strided_slice %96 {offsets = [0, 0], sizes = [8, 4], strides = [1, 1]} : vector<9x4xf32> to vector<8x4xf32>
    %103 = vector.broadcast %101 : vector<8x1xf32> to vector<8x4xf32>
    %104 = arith.mulf %102, %103 : vector<8x4xf32>
    %cst_19 = arith.constant dense<0.000000e+00> : vector<4xf32>
    %105 = vector.multi_reduction <add>, %104, %cst_19 [0] : vector<8x4xf32> to vector<4xf32>
    %106 = vector.shape_cast %105 : vector<4xf32> to vector<1x4xf32>
    %107 = arith.addf %97, %106 : vector<1x4xf32>
    %108 = arith.negf %107 : vector<1x4xf32>
    %109 = math.exp %108 : vector<1x4xf32>
    %cst_20 = arith.constant 1.000000e+00 : f32
    %110 = vector.broadcast %cst_20 : f32 to vector<1x4xf32>
    %111 = arith.addf %110, %109 : vector<1x4xf32>
    %112 = arith.divf %110, %111 : vector<1x4xf32>
    %c0_21 = arith.constant 0 : index
    %c0_22 = arith.constant 0 : index
    %c0_23 = arith.constant 0 : index
    %113 = vector.load %arg7[%c0_21, %c0_22, %c0_23] : memref<4x8x9xf32, #tpu.memory_space<vmem>>, vector<4x8x9xf32>
    %114 = vector.extract_strided_slice %112 {offsets = [0, 0], sizes = [1, 1], strides = [1, 1]} : vector<1x4xf32> to vector<1x1xf32>
    %115 = vector.extract_strided_slice %113 {offsets = [0, 0, 0], sizes = [1, 8, 9], strides = [1, 1, 1]} : vector<4x8x9xf32> to vector<1x8x9xf32>
    %116 = vector.shape_cast %115 : vector<1x8x9xf32> to vector<8x9xf32>
    %117 = vector.broadcast %114 : vector<1x1xf32> to vector<8x9xf32>
    %118 = arith.mulf %117, %116 : vector<8x9xf32>
    %119 = vector.extract_strided_slice %112 {offsets = [0, 1], sizes = [1, 1], strides = [1, 1]} : vector<1x4xf32> to vector<1x1xf32>
    %120 = vector.extract_strided_slice %113 {offsets = [1, 0, 0], sizes = [1, 8, 9], strides = [1, 1, 1]} : vector<4x8x9xf32> to vector<1x8x9xf32>
    %121 = vector.shape_cast %120 : vector<1x8x9xf32> to vector<8x9xf32>
    %122 = vector.broadcast %119 : vector<1x1xf32> to vector<8x9xf32>
    %123 = arith.mulf %122, %121 : vector<8x9xf32>
    %124 = arith.addf %118, %123 : vector<8x9xf32>
    %125 = vector.extract_strided_slice %112 {offsets = [0, 2], sizes = [1, 1], strides = [1, 1]} : vector<1x4xf32> to vector<1x1xf32>
    %126 = vector.extract_strided_slice %113 {offsets = [2, 0, 0], sizes = [1, 8, 9], strides = [1, 1, 1]} : vector<4x8x9xf32> to vector<1x8x9xf32>
    %127 = vector.shape_cast %126 : vector<1x8x9xf32> to vector<8x9xf32>
    %128 = vector.broadcast %125 : vector<1x1xf32> to vector<8x9xf32>
    %129 = arith.mulf %128, %127 : vector<8x9xf32>
    %130 = arith.addf %124, %129 : vector<8x9xf32>
    %131 = vector.extract_strided_slice %112 {offsets = [0, 3], sizes = [1, 1], strides = [1, 1]} : vector<1x4xf32> to vector<1x1xf32>
    %132 = vector.extract_strided_slice %113 {offsets = [3, 0, 0], sizes = [1, 8, 9], strides = [1, 1, 1]} : vector<4x8x9xf32> to vector<1x8x9xf32>
    %133 = vector.shape_cast %132 : vector<1x8x9xf32> to vector<8x9xf32>
    %134 = vector.broadcast %131 : vector<1x1xf32> to vector<8x9xf32>
    %135 = arith.mulf %134, %133 : vector<8x9xf32>
    %136 = arith.addf %130, %135 : vector<8x9xf32>
    %c17_i32 = arith.constant 17 : i32
    %137 = tpu.dynamic_rotate %95 by %c17_i32 dim 1 : vector<8x256xf32>, i32 -> vector<8x256xf32>
    %138 = vector.extract_strided_slice %0 {offsets = [0, 0], sizes = [1, 256], strides = [1, 1]} : vector<9x256xf32> to vector<1x256xf32>
    %139 = vector.broadcast %138 : vector<1x256xf32> to vector<8x256xf32>
    %140 = arith.mulf %137, %139 : vector<8x256xf32>
    %141 = vector.extract_strided_slice %136 {offsets = [0, 0], sizes = [8, 1], strides = [1, 1]} : vector<8x9xf32> to vector<8x1xf32>
    %142 = vector.broadcast %141 : vector<8x1xf32> to vector<8x256xf32>
    %143 = arith.mulf %140, %142 : vector<8x256xf32>
    %c16_i32 = arith.constant 16 : i32
    %144 = tpu.dynamic_rotate %95 by %c16_i32 dim 1 : vector<8x256xf32>, i32 -> vector<8x256xf32>
    %145 = vector.extract_strided_slice %0 {offsets = [1, 0], sizes = [1, 256], strides = [1, 1]} : vector<9x256xf32> to vector<1x256xf32>
    %146 = vector.broadcast %145 : vector<1x256xf32> to vector<8x256xf32>
    %147 = arith.mulf %144, %146 : vector<8x256xf32>
    %148 = vector.extract_strided_slice %136 {offsets = [0, 1], sizes = [8, 1], strides = [1, 1]} : vector<8x9xf32> to vector<8x1xf32>
    %149 = vector.broadcast %148 : vector<8x1xf32> to vector<8x256xf32>
    %150 = arith.mulf %147, %149 : vector<8x256xf32>
    %151 = arith.addf %143, %150 : vector<8x256xf32>
    %c15_i32 = arith.constant 15 : i32
    %152 = tpu.dynamic_rotate %95 by %c15_i32 dim 1 : vector<8x256xf32>, i32 -> vector<8x256xf32>
    %153 = vector.extract_strided_slice %0 {offsets = [2, 0], sizes = [1, 256], strides = [1, 1]} : vector<9x256xf32> to vector<1x256xf32>
    %154 = vector.broadcast %153 : vector<1x256xf32> to vector<8x256xf32>
    %155 = arith.mulf %152, %154 : vector<8x256xf32>
    %156 = vector.extract_strided_slice %136 {offsets = [0, 2], sizes = [8, 1], strides = [1, 1]} : vector<8x9xf32> to vector<8x1xf32>
    %157 = vector.broadcast %156 : vector<8x1xf32> to vector<8x256xf32>
    %158 = arith.mulf %155, %157 : vector<8x256xf32>
    %159 = arith.addf %151, %158 : vector<8x256xf32>
    %c1_i32 = arith.constant 1 : i32
    %160 = tpu.dynamic_rotate %95 by %c1_i32 dim 1 : vector<8x256xf32>, i32 -> vector<8x256xf32>
    %161 = vector.extract_strided_slice %0 {offsets = [3, 0], sizes = [1, 256], strides = [1, 1]} : vector<9x256xf32> to vector<1x256xf32>
    %162 = vector.broadcast %161 : vector<1x256xf32> to vector<8x256xf32>
    %163 = arith.mulf %160, %162 : vector<8x256xf32>
    %164 = vector.extract_strided_slice %136 {offsets = [0, 3], sizes = [8, 1], strides = [1, 1]} : vector<8x9xf32> to vector<8x1xf32>
    %165 = vector.broadcast %164 : vector<8x1xf32> to vector<8x256xf32>
    %166 = arith.mulf %163, %165 : vector<8x256xf32>
    %167 = arith.addf %159, %166 : vector<8x256xf32>
    %168 = vector.extract_strided_slice %136 {offsets = [0, 4], sizes = [8, 1], strides = [1, 1]} : vector<8x9xf32> to vector<8x1xf32>
    %169 = vector.broadcast %168 : vector<8x1xf32> to vector<8x256xf32>
    %170 = arith.mulf %95, %169 : vector<8x256xf32>
    %171 = arith.addf %167, %170 : vector<8x256xf32>
    %c255_i32 = arith.constant 255 : i32
    %172 = tpu.dynamic_rotate %95 by %c255_i32 dim 1 : vector<8x256xf32>, i32 -> vector<8x256xf32>
    %173 = vector.extract_strided_slice %0 {offsets = [5, 0], sizes = [1, 256], strides = [1, 1]} : vector<9x256xf32> to vector<1x256xf32>
    %174 = vector.broadcast %173 : vector<1x256xf32> to vector<8x256xf32>
    %175 = arith.mulf %172, %174 : vector<8x256xf32>
    %176 = vector.extract_strided_slice %136 {offsets = [0, 5], sizes = [8, 1], strides = [1, 1]} : vector<8x9xf32> to vector<8x1xf32>
    %177 = vector.broadcast %176 : vector<8x1xf32> to vector<8x256xf32>
    %178 = arith.mulf %175, %177 : vector<8x256xf32>
    %179 = arith.addf %171, %178 : vector<8x256xf32>
    %c241_i32 = arith.constant 241 : i32
    %180 = tpu.dynamic_rotate %95 by %c241_i32 dim 1 : vector<8x256xf32>, i32 -> vector<8x256xf32>
    %181 = vector.extract_strided_slice %0 {offsets = [6, 0], sizes = [1, 256], strides = [1, 1]} : vector<9x256xf32> to vector<1x256xf32>
    %182 = vector.broadcast %181 : vector<1x256xf32> to vector<8x256xf32>
    %183 = arith.mulf %180, %182 : vector<8x256xf32>
    %184 = vector.extract_strided_slice %136 {offsets = [0, 6], sizes = [8, 1], strides = [1, 1]} : vector<8x9xf32> to vector<8x1xf32>
    %185 = vector.broadcast %184 : vector<8x1xf32> to vector<8x256xf32>
    %186 = arith.mulf %183, %185 : vector<8x256xf32>
    %187 = arith.addf %179, %186 : vector<8x256xf32>
    %c240_i32 = arith.constant 240 : i32
    %188 = tpu.dynamic_rotate %95 by %c240_i32 dim 1 : vector<8x256xf32>, i32 -> vector<8x256xf32>
    %189 = vector.extract_strided_slice %0 {offsets = [7, 0], sizes = [1, 256], strides = [1, 1]} : vector<9x256xf32> to vector<1x256xf32>
    %190 = vector.broadcast %189 : vector<1x256xf32> to vector<8x256xf32>
    %191 = arith.mulf %188, %190 : vector<8x256xf32>
    %192 = vector.extract_strided_slice %136 {offsets = [0, 7], sizes = [8, 1], strides = [1, 1]} : vector<8x9xf32> to vector<8x1xf32>
    %193 = vector.broadcast %192 : vector<8x1xf32> to vector<8x256xf32>
    %194 = arith.mulf %191, %193 : vector<8x256xf32>
    %195 = arith.addf %187, %194 : vector<8x256xf32>
    %c239_i32 = arith.constant 239 : i32
    %196 = tpu.dynamic_rotate %95 by %c239_i32 dim 1 : vector<8x256xf32>, i32 -> vector<8x256xf32>
    %197 = vector.extract_strided_slice %0 {offsets = [8, 0], sizes = [1, 256], strides = [1, 1]} : vector<9x256xf32> to vector<1x256xf32>
    %198 = vector.broadcast %197 : vector<1x256xf32> to vector<8x256xf32>
    %199 = arith.mulf %196, %198 : vector<8x256xf32>
    %200 = vector.extract_strided_slice %136 {offsets = [0, 8], sizes = [8, 1], strides = [1, 1]} : vector<8x9xf32> to vector<8x1xf32>
    %201 = vector.broadcast %200 : vector<8x1xf32> to vector<8x256xf32>
    %202 = arith.mulf %199, %201 : vector<8x256xf32>
    %203 = arith.addf %195, %202 : vector<8x256xf32>
    %c0_24 = arith.constant 0 : index
    %c0_25 = arith.constant 0 : index
    %204 = vector.load %arg8[%c0_24, %c0_25] : memref<8x1xf32, #tpu.memory_space<vmem>>, vector<8x1xf32>
    %205 = vector.broadcast %204 : vector<8x1xf32> to vector<8x256xf32>
    %206 = arith.addf %203, %205 : vector<8x256xf32>
    %cst_26 = arith.constant 0.000000e+00 : f32
    %207 = vector.broadcast %cst_26 : f32 to vector<8x256xf32>
    %208 = arith.maximumf %206, %207 : vector<8x256xf32>
    %c0_27 = arith.constant 0 : index
    %c0_28 = arith.constant 0 : index
    %209 = vector.load %arg9[%c0_27, %c0_28] : memref<17x4xf32, #tpu.memory_space<vmem>>, vector<17x4xf32>
    %210 = vector.extract_strided_slice %209 {offsets = [16, 0], sizes = [1, 4], strides = [1, 1]} : vector<17x4xf32> to vector<1x4xf32>
    %cst_29 = arith.constant dense<0.000000e+00> : vector<8xf32>
    %211 = vector.multi_reduction <add>, %95, %cst_29 [1] : vector<8x256xf32> to vector<8xf32>
    %212 = vector.shape_cast %211 : vector<8xf32> to vector<8x1xf32>
    %cst_30 = arith.constant 3.906250e-03 : f32
    %213 = vector.broadcast %cst_30 : f32 to vector<8x1xf32>
    %214 = arith.mulf %212, %213 : vector<8x1xf32>
    %215 = vector.extract_strided_slice %209 {offsets = [0, 0], sizes = [8, 4], strides = [1, 1]} : vector<17x4xf32> to vector<8x4xf32>
    %216 = vector.broadcast %214 : vector<8x1xf32> to vector<8x4xf32>
    %217 = arith.mulf %215, %216 : vector<8x4xf32>
    %cst_31 = arith.constant dense<0.000000e+00> : vector<4xf32>
    %218 = vector.multi_reduction <add>, %217, %cst_31 [0] : vector<8x4xf32> to vector<4xf32>
    %219 = vector.shape_cast %218 : vector<4xf32> to vector<1x4xf32>
    %220 = arith.addf %210, %219 : vector<1x4xf32>
    %cst_32 = arith.constant dense<0.000000e+00> : vector<8xf32>
    %221 = vector.multi_reduction <add>, %208, %cst_32 [1] : vector<8x256xf32> to vector<8xf32>
    %222 = vector.shape_cast %221 : vector<8xf32> to vector<8x1xf32>
    %cst_33 = arith.constant 3.906250e-03 : f32
    %223 = vector.broadcast %cst_33 : f32 to vector<8x1xf32>
    %224 = arith.mulf %222, %223 : vector<8x1xf32>
    %225 = vector.extract_strided_slice %209 {offsets = [8, 0], sizes = [8, 4], strides = [1, 1]} : vector<17x4xf32> to vector<8x4xf32>
    %226 = vector.broadcast %224 : vector<8x1xf32> to vector<8x4xf32>
    %227 = arith.mulf %225, %226 : vector<8x4xf32>
    %cst_34 = arith.constant dense<0.000000e+00> : vector<4xf32>
    %228 = vector.multi_reduction <add>, %227, %cst_34 [0] : vector<8x4xf32> to vector<4xf32>
    %229 = vector.shape_cast %228 : vector<4xf32> to vector<1x4xf32>
    %230 = arith.addf %220, %229 : vector<1x4xf32>
    %231 = arith.negf %230 : vector<1x4xf32>
    %232 = math.exp %231 : vector<1x4xf32>
    %cst_35 = arith.constant 1.000000e+00 : f32
    %233 = vector.broadcast %cst_35 : f32 to vector<1x4xf32>
    %234 = arith.addf %233, %232 : vector<1x4xf32>
    %235 = arith.divf %233, %234 : vector<1x4xf32>
    %c0_36 = arith.constant 0 : index
    %c0_37 = arith.constant 0 : index
    %c0_38 = arith.constant 0 : index
    %236 = vector.load %arg10[%c0_36, %c0_37, %c0_38] : memref<4x4x16xf32, #tpu.memory_space<vmem>>, vector<4x4x16xf32>
    %237 = vector.extract_strided_slice %235 {offsets = [0, 0], sizes = [1, 1], strides = [1, 1]} : vector<1x4xf32> to vector<1x1xf32>
    %238 = vector.extract_strided_slice %236 {offsets = [0, 0, 0], sizes = [1, 4, 16], strides = [1, 1, 1]} : vector<4x4x16xf32> to vector<1x4x16xf32>
    %239 = vector.shape_cast %238 : vector<1x4x16xf32> to vector<4x16xf32>
    %240 = vector.broadcast %237 : vector<1x1xf32> to vector<4x16xf32>
    %241 = arith.mulf %240, %239 : vector<4x16xf32>
    %242 = vector.extract_strided_slice %235 {offsets = [0, 1], sizes = [1, 1], strides = [1, 1]} : vector<1x4xf32> to vector<1x1xf32>
    %243 = vector.extract_strided_slice %236 {offsets = [1, 0, 0], sizes = [1, 4, 16], strides = [1, 1, 1]} : vector<4x4x16xf32> to vector<1x4x16xf32>
    %244 = vector.shape_cast %243 : vector<1x4x16xf32> to vector<4x16xf32>
    %245 = vector.broadcast %242 : vector<1x1xf32> to vector<4x16xf32>
    %246 = arith.mulf %245, %244 : vector<4x16xf32>
    %247 = arith.addf %241, %246 : vector<4x16xf32>
    %248 = vector.extract_strided_slice %235 {offsets = [0, 2], sizes = [1, 1], strides = [1, 1]} : vector<1x4xf32> to vector<1x1xf32>
    %249 = vector.extract_strided_slice %236 {offsets = [2, 0, 0], sizes = [1, 4, 16], strides = [1, 1, 1]} : vector<4x4x16xf32> to vector<1x4x16xf32>
    %250 = vector.shape_cast %249 : vector<1x4x16xf32> to vector<4x16xf32>
    %251 = vector.broadcast %248 : vector<1x1xf32> to vector<4x16xf32>
    %252 = arith.mulf %251, %250 : vector<4x16xf32>
    %253 = arith.addf %247, %252 : vector<4x16xf32>
    %254 = vector.extract_strided_slice %235 {offsets = [0, 3], sizes = [1, 1], strides = [1, 1]} : vector<1x4xf32> to vector<1x1xf32>
    %255 = vector.extract_strided_slice %236 {offsets = [3, 0, 0], sizes = [1, 4, 16], strides = [1, 1, 1]} : vector<4x4x16xf32> to vector<1x4x16xf32>
    %256 = vector.shape_cast %255 : vector<1x4x16xf32> to vector<4x16xf32>
    %257 = vector.broadcast %254 : vector<1x1xf32> to vector<4x16xf32>
    %258 = arith.mulf %257, %256 : vector<4x16xf32>
    %259 = arith.addf %253, %258 : vector<4x16xf32>
    %260 = vector.extract_strided_slice %259 {offsets = [0, 0], sizes = [4, 1], strides = [1, 1]} : vector<4x16xf32> to vector<4x1xf32>
    %261 = vector.extract_strided_slice %95 {offsets = [0, 0], sizes = [1, 256], strides = [1, 1]} : vector<8x256xf32> to vector<1x256xf32>
    %262 = vector.broadcast %260 : vector<4x1xf32> to vector<4x256xf32>
    %263 = vector.broadcast %261 : vector<1x256xf32> to vector<4x256xf32>
    %264 = arith.mulf %262, %263 : vector<4x256xf32>
    %265 = vector.extract_strided_slice %259 {offsets = [0, 1], sizes = [4, 1], strides = [1, 1]} : vector<4x16xf32> to vector<4x1xf32>
    %266 = vector.extract_strided_slice %95 {offsets = [1, 0], sizes = [1, 256], strides = [1, 1]} : vector<8x256xf32> to vector<1x256xf32>
    %267 = vector.broadcast %265 : vector<4x1xf32> to vector<4x256xf32>
    %268 = vector.broadcast %266 : vector<1x256xf32> to vector<4x256xf32>
    %269 = arith.mulf %267, %268 : vector<4x256xf32>
    %270 = arith.addf %264, %269 : vector<4x256xf32>
    %271 = vector.extract_strided_slice %259 {offsets = [0, 2], sizes = [4, 1], strides = [1, 1]} : vector<4x16xf32> to vector<4x1xf32>
    %272 = vector.extract_strided_slice %95 {offsets = [2, 0], sizes = [1, 256], strides = [1, 1]} : vector<8x256xf32> to vector<1x256xf32>
    %273 = vector.broadcast %271 : vector<4x1xf32> to vector<4x256xf32>
    %274 = vector.broadcast %272 : vector<1x256xf32> to vector<4x256xf32>
    %275 = arith.mulf %273, %274 : vector<4x256xf32>
    %276 = arith.addf %270, %275 : vector<4x256xf32>
    %277 = vector.extract_strided_slice %259 {offsets = [0, 3], sizes = [4, 1], strides = [1, 1]} : vector<4x16xf32> to vector<4x1xf32>
    %278 = vector.extract_strided_slice %95 {offsets = [3, 0], sizes = [1, 256], strides = [1, 1]} : vector<8x256xf32> to vector<1x256xf32>
    %279 = vector.broadcast %277 : vector<4x1xf32> to vector<4x256xf32>
    %280 = vector.broadcast %278 : vector<1x256xf32> to vector<4x256xf32>
    %281 = arith.mulf %279, %280 : vector<4x256xf32>
    %282 = arith.addf %276, %281 : vector<4x256xf32>
    %283 = vector.extract_strided_slice %259 {offsets = [0, 4], sizes = [4, 1], strides = [1, 1]} : vector<4x16xf32> to vector<4x1xf32>
    %284 = vector.extract_strided_slice %95 {offsets = [4, 0], sizes = [1, 256], strides = [1, 1]} : vector<8x256xf32> to vector<1x256xf32>
    %285 = vector.broadcast %283 : vector<4x1xf32> to vector<4x256xf32>
    %286 = vector.broadcast %284 : vector<1x256xf32> to vector<4x256xf32>
    %287 = arith.mulf %285, %286 : vector<4x256xf32>
    %288 = arith.addf %282, %287 : vector<4x256xf32>
    %289 = vector.extract_strided_slice %259 {offsets = [0, 5], sizes = [4, 1], strides = [1, 1]} : vector<4x16xf32> to vector<4x1xf32>
    %290 = vector.extract_strided_slice %95 {offsets = [5, 0], sizes = [1, 256], strides = [1, 1]} : vector<8x256xf32> to vector<1x256xf32>
    %291 = vector.broadcast %289 : vector<4x1xf32> to vector<4x256xf32>
    %292 = vector.broadcast %290 : vector<1x256xf32> to vector<4x256xf32>
    %293 = arith.mulf %291, %292 : vector<4x256xf32>
    %294 = arith.addf %288, %293 : vector<4x256xf32>
    %295 = vector.extract_strided_slice %259 {offsets = [0, 6], sizes = [4, 1], strides = [1, 1]} : vector<4x16xf32> to vector<4x1xf32>
    %296 = vector.extract_strided_slice %95 {offsets = [6, 0], sizes = [1, 256], strides = [1, 1]} : vector<8x256xf32> to vector<1x256xf32>
    %297 = vector.broadcast %295 : vector<4x1xf32> to vector<4x256xf32>
    %298 = vector.broadcast %296 : vector<1x256xf32> to vector<4x256xf32>
    %299 = arith.mulf %297, %298 : vector<4x256xf32>
    %300 = arith.addf %294, %299 : vector<4x256xf32>
    %301 = vector.extract_strided_slice %259 {offsets = [0, 7], sizes = [4, 1], strides = [1, 1]} : vector<4x16xf32> to vector<4x1xf32>
    %302 = vector.extract_strided_slice %95 {offsets = [7, 0], sizes = [1, 256], strides = [1, 1]} : vector<8x256xf32> to vector<1x256xf32>
    %303 = vector.broadcast %301 : vector<4x1xf32> to vector<4x256xf32>
    %304 = vector.broadcast %302 : vector<1x256xf32> to vector<4x256xf32>
    %305 = arith.mulf %303, %304 : vector<4x256xf32>
    %306 = arith.addf %300, %305 : vector<4x256xf32>
    %307 = vector.extract_strided_slice %259 {offsets = [0, 8], sizes = [4, 1], strides = [1, 1]} : vector<4x16xf32> to vector<4x1xf32>
    %308 = vector.extract_strided_slice %208 {offsets = [0, 0], sizes = [1, 256], strides = [1, 1]} : vector<8x256xf32> to vector<1x256xf32>
    %309 = vector.broadcast %307 : vector<4x1xf32> to vector<4x256xf32>
    %310 = vector.broadcast %308 : vector<1x256xf32> to vector<4x256xf32>
    %311 = arith.mulf %309, %310 : vector<4x256xf32>
    %312 = arith.addf %306, %311 : vector<4x256xf32>
    %313 = vector.extract_strided_slice %259 {offsets = [0, 9], sizes = [4, 1], strides = [1, 1]} : vector<4x16xf32> to vector<4x1xf32>
    %314 = vector.extract_strided_slice %208 {offsets = [1, 0], sizes = [1, 256], strides = [1, 1]} : vector<8x256xf32> to vector<1x256xf32>
    %315 = vector.broadcast %313 : vector<4x1xf32> to vector<4x256xf32>
    %316 = vector.broadcast %314 : vector<1x256xf32> to vector<4x256xf32>
    %317 = arith.mulf %315, %316 : vector<4x256xf32>
    %318 = arith.addf %312, %317 : vector<4x256xf32>
    %319 = vector.extract_strided_slice %259 {offsets = [0, 10], sizes = [4, 1], strides = [1, 1]} : vector<4x16xf32> to vector<4x1xf32>
    %320 = vector.extract_strided_slice %208 {offsets = [2, 0], sizes = [1, 256], strides = [1, 1]} : vector<8x256xf32> to vector<1x256xf32>
    %321 = vector.broadcast %319 : vector<4x1xf32> to vector<4x256xf32>
    %322 = vector.broadcast %320 : vector<1x256xf32> to vector<4x256xf32>
    %323 = arith.mulf %321, %322 : vector<4x256xf32>
    %324 = arith.addf %318, %323 : vector<4x256xf32>
    %325 = vector.extract_strided_slice %259 {offsets = [0, 11], sizes = [4, 1], strides = [1, 1]} : vector<4x16xf32> to vector<4x1xf32>
    %326 = vector.extract_strided_slice %208 {offsets = [3, 0], sizes = [1, 256], strides = [1, 1]} : vector<8x256xf32> to vector<1x256xf32>
    %327 = vector.broadcast %325 : vector<4x1xf32> to vector<4x256xf32>
    %328 = vector.broadcast %326 : vector<1x256xf32> to vector<4x256xf32>
    %329 = arith.mulf %327, %328 : vector<4x256xf32>
    %330 = arith.addf %324, %329 : vector<4x256xf32>
    %331 = vector.extract_strided_slice %259 {offsets = [0, 12], sizes = [4, 1], strides = [1, 1]} : vector<4x16xf32> to vector<4x1xf32>
    %332 = vector.extract_strided_slice %208 {offsets = [4, 0], sizes = [1, 256], strides = [1, 1]} : vector<8x256xf32> to vector<1x256xf32>
    %333 = vector.broadcast %331 : vector<4x1xf32> to vector<4x256xf32>
    %334 = vector.broadcast %332 : vector<1x256xf32> to vector<4x256xf32>
    %335 = arith.mulf %333, %334 : vector<4x256xf32>
    %336 = arith.addf %330, %335 : vector<4x256xf32>
    %337 = vector.extract_strided_slice %259 {offsets = [0, 13], sizes = [4, 1], strides = [1, 1]} : vector<4x16xf32> to vector<4x1xf32>
    %338 = vector.extract_strided_slice %208 {offsets = [5, 0], sizes = [1, 256], strides = [1, 1]} : vector<8x256xf32> to vector<1x256xf32>
    %339 = vector.broadcast %337 : vector<4x1xf32> to vector<4x256xf32>
    %340 = vector.broadcast %338 : vector<1x256xf32> to vector<4x256xf32>
    %341 = arith.mulf %339, %340 : vector<4x256xf32>
    %342 = arith.addf %336, %341 : vector<4x256xf32>
    %343 = vector.extract_strided_slice %259 {offsets = [0, 14], sizes = [4, 1], strides = [1, 1]} : vector<4x16xf32> to vector<4x1xf32>
    %344 = vector.extract_strided_slice %208 {offsets = [6, 0], sizes = [1, 256], strides = [1, 1]} : vector<8x256xf32> to vector<1x256xf32>
    %345 = vector.broadcast %343 : vector<4x1xf32> to vector<4x256xf32>
    %346 = vector.broadcast %344 : vector<1x256xf32> to vector<4x256xf32>
    %347 = arith.mulf %345, %346 : vector<4x256xf32>
    %348 = arith.addf %342, %347 : vector<4x256xf32>
    %349 = vector.extract_strided_slice %259 {offsets = [0, 15], sizes = [4, 1], strides = [1, 1]} : vector<4x16xf32> to vector<4x1xf32>
    %350 = vector.extract_strided_slice %208 {offsets = [7, 0], sizes = [1, 256], strides = [1, 1]} : vector<8x256xf32> to vector<1x256xf32>
    %351 = vector.broadcast %349 : vector<4x1xf32> to vector<4x256xf32>
    %352 = vector.broadcast %350 : vector<1x256xf32> to vector<4x256xf32>
    %353 = arith.mulf %351, %352 : vector<4x256xf32>
    %354 = arith.addf %348, %353 : vector<4x256xf32>
    %c0_39 = arith.constant 0 : index
    %c0_40 = arith.constant 0 : index
    %355 = vector.load %arg11[%c0_39, %c0_40] : memref<4x1xf32, #tpu.memory_space<vmem>>, vector<4x1xf32>
    %356 = vector.broadcast %355 : vector<4x1xf32> to vector<4x256xf32>
    %357 = arith.addf %354, %356 : vector<4x256xf32>
    %c0_41 = arith.constant 0 : index
    %c0_42 = arith.constant 0 : index
    %358 = vector.load %arg12[%c0_41, %c0_42] : memref<5x4xf32, #tpu.memory_space<vmem>>, vector<5x4xf32>
    %359 = vector.extract_strided_slice %358 {offsets = [4, 0], sizes = [1, 4], strides = [1, 1]} : vector<5x4xf32> to vector<1x4xf32>
    %cst_43 = arith.constant dense<0.000000e+00> : vector<4xf32>
    %360 = vector.multi_reduction <add>, %357, %cst_43 [1] : vector<4x256xf32> to vector<4xf32>
    %361 = vector.shape_cast %360 : vector<4xf32> to vector<4x1xf32>
    %cst_44 = arith.constant 3.906250e-03 : f32
    %362 = vector.broadcast %cst_44 : f32 to vector<4x1xf32>
    %363 = arith.mulf %361, %362 : vector<4x1xf32>
    %364 = vector.extract_strided_slice %358 {offsets = [0, 0], sizes = [4, 4], strides = [1, 1]} : vector<5x4xf32> to vector<4x4xf32>
    %365 = vector.broadcast %363 : vector<4x1xf32> to vector<4x4xf32>
    %366 = arith.mulf %364, %365 : vector<4x4xf32>
    %cst_45 = arith.constant dense<0.000000e+00> : vector<4xf32>
    %367 = vector.multi_reduction <add>, %366, %cst_45 [0] : vector<4x4xf32> to vector<4xf32>
    %368 = vector.shape_cast %367 : vector<4xf32> to vector<1x4xf32>
    %369 = arith.addf %359, %368 : vector<1x4xf32>
    %370 = arith.negf %369 : vector<1x4xf32>
    %371 = math.exp %370 : vector<1x4xf32>
    %cst_46 = arith.constant 1.000000e+00 : f32
    %372 = vector.broadcast %cst_46 : f32 to vector<1x4xf32>
    %373 = arith.addf %372, %371 : vector<1x4xf32>
    %374 = arith.divf %372, %373 : vector<1x4xf32>
    %c0_47 = arith.constant 0 : index
    %c0_48 = arith.constant 0 : index
    %c0_49 = arith.constant 0 : index
    %375 = vector.load %arg13[%c0_47, %c0_48, %c0_49] : memref<4x4x9xf32, #tpu.memory_space<vmem>>, vector<4x4x9xf32>
    %376 = vector.extract_strided_slice %374 {offsets = [0, 0], sizes = [1, 1], strides = [1, 1]} : vector<1x4xf32> to vector<1x1xf32>
    %377 = vector.extract_strided_slice %375 {offsets = [0, 0, 0], sizes = [1, 4, 9], strides = [1, 1, 1]} : vector<4x4x9xf32> to vector<1x4x9xf32>
    %378 = vector.shape_cast %377 : vector<1x4x9xf32> to vector<4x9xf32>
    %379 = vector.broadcast %376 : vector<1x1xf32> to vector<4x9xf32>
    %380 = arith.mulf %379, %378 : vector<4x9xf32>
    %381 = vector.extract_strided_slice %374 {offsets = [0, 1], sizes = [1, 1], strides = [1, 1]} : vector<1x4xf32> to vector<1x1xf32>
    %382 = vector.extract_strided_slice %375 {offsets = [1, 0, 0], sizes = [1, 4, 9], strides = [1, 1, 1]} : vector<4x4x9xf32> to vector<1x4x9xf32>
    %383 = vector.shape_cast %382 : vector<1x4x9xf32> to vector<4x9xf32>
    %384 = vector.broadcast %381 : vector<1x1xf32> to vector<4x9xf32>
    %385 = arith.mulf %384, %383 : vector<4x9xf32>
    %386 = arith.addf %380, %385 : vector<4x9xf32>
    %387 = vector.extract_strided_slice %374 {offsets = [0, 2], sizes = [1, 1], strides = [1, 1]} : vector<1x4xf32> to vector<1x1xf32>
    %388 = vector.extract_strided_slice %375 {offsets = [2, 0, 0], sizes = [1, 4, 9], strides = [1, 1, 1]} : vector<4x4x9xf32> to vector<1x4x9xf32>
    %389 = vector.shape_cast %388 : vector<1x4x9xf32> to vector<4x9xf32>
    %390 = vector.broadcast %387 : vector<1x1xf32> to vector<4x9xf32>
    %391 = arith.mulf %390, %389 : vector<4x9xf32>
    %392 = arith.addf %386, %391 : vector<4x9xf32>
    %393 = vector.extract_strided_slice %374 {offsets = [0, 3], sizes = [1, 1], strides = [1, 1]} : vector<1x4xf32> to vector<1x1xf32>
    %394 = vector.extract_strided_slice %375 {offsets = [3, 0, 0], sizes = [1, 4, 9], strides = [1, 1, 1]} : vector<4x4x9xf32> to vector<1x4x9xf32>
    %395 = vector.shape_cast %394 : vector<1x4x9xf32> to vector<4x9xf32>
    %396 = vector.broadcast %393 : vector<1x1xf32> to vector<4x9xf32>
    %397 = arith.mulf %396, %395 : vector<4x9xf32>
    %398 = arith.addf %392, %397 : vector<4x9xf32>
    %c17_i32_50 = arith.constant 17 : i32
    %399 = tpu.dynamic_rotate %357 by %c17_i32_50 dim 1 : vector<4x256xf32>, i32 -> vector<4x256xf32>
    %400 = vector.extract_strided_slice %0 {offsets = [0, 0], sizes = [1, 256], strides = [1, 1]} : vector<9x256xf32> to vector<1x256xf32>
    %401 = vector.broadcast %400 : vector<1x256xf32> to vector<4x256xf32>
    %402 = arith.mulf %399, %401 : vector<4x256xf32>
    %403 = vector.extract_strided_slice %398 {offsets = [0, 0], sizes = [4, 1], strides = [1, 1]} : vector<4x9xf32> to vector<4x1xf32>
    %404 = vector.broadcast %403 : vector<4x1xf32> to vector<4x256xf32>
    %405 = arith.mulf %402, %404 : vector<4x256xf32>
    %c16_i32_51 = arith.constant 16 : i32
    %406 = tpu.dynamic_rotate %357 by %c16_i32_51 dim 1 : vector<4x256xf32>, i32 -> vector<4x256xf32>
    %407 = vector.extract_strided_slice %0 {offsets = [1, 0], sizes = [1, 256], strides = [1, 1]} : vector<9x256xf32> to vector<1x256xf32>
    %408 = vector.broadcast %407 : vector<1x256xf32> to vector<4x256xf32>
    %409 = arith.mulf %406, %408 : vector<4x256xf32>
    %410 = vector.extract_strided_slice %398 {offsets = [0, 1], sizes = [4, 1], strides = [1, 1]} : vector<4x9xf32> to vector<4x1xf32>
    %411 = vector.broadcast %410 : vector<4x1xf32> to vector<4x256xf32>
    %412 = arith.mulf %409, %411 : vector<4x256xf32>
    %413 = arith.addf %405, %412 : vector<4x256xf32>
    %c15_i32_52 = arith.constant 15 : i32
    %414 = tpu.dynamic_rotate %357 by %c15_i32_52 dim 1 : vector<4x256xf32>, i32 -> vector<4x256xf32>
    %415 = vector.extract_strided_slice %0 {offsets = [2, 0], sizes = [1, 256], strides = [1, 1]} : vector<9x256xf32> to vector<1x256xf32>
    %416 = vector.broadcast %415 : vector<1x256xf32> to vector<4x256xf32>
    %417 = arith.mulf %414, %416 : vector<4x256xf32>
    %418 = vector.extract_strided_slice %398 {offsets = [0, 2], sizes = [4, 1], strides = [1, 1]} : vector<4x9xf32> to vector<4x1xf32>
    %419 = vector.broadcast %418 : vector<4x1xf32> to vector<4x256xf32>
    %420 = arith.mulf %417, %419 : vector<4x256xf32>
    %421 = arith.addf %413, %420 : vector<4x256xf32>
    %c1_i32_53 = arith.constant 1 : i32
    %422 = tpu.dynamic_rotate %357 by %c1_i32_53 dim 1 : vector<4x256xf32>, i32 -> vector<4x256xf32>
    %423 = vector.extract_strided_slice %0 {offsets = [3, 0], sizes = [1, 256], strides = [1, 1]} : vector<9x256xf32> to vector<1x256xf32>
    %424 = vector.broadcast %423 : vector<1x256xf32> to vector<4x256xf32>
    %425 = arith.mulf %422, %424 : vector<4x256xf32>
    %426 = vector.extract_strided_slice %398 {offsets = [0, 3], sizes = [4, 1], strides = [1, 1]} : vector<4x9xf32> to vector<4x1xf32>
    %427 = vector.broadcast %426 : vector<4x1xf32> to vector<4x256xf32>
    %428 = arith.mulf %425, %427 : vector<4x256xf32>
    %429 = arith.addf %421, %428 : vector<4x256xf32>
    %430 = vector.extract_strided_slice %398 {offsets = [0, 4], sizes = [4, 1], strides = [1, 1]} : vector<4x9xf32> to vector<4x1xf32>
    %431 = vector.broadcast %430 : vector<4x1xf32> to vector<4x256xf32>
    %432 = arith.mulf %357, %431 : vector<4x256xf32>
    %433 = arith.addf %429, %432 : vector<4x256xf32>
    %c255_i32_54 = arith.constant 255 : i32
    %434 = tpu.dynamic_rotate %357 by %c255_i32_54 dim 1 : vector<4x256xf32>, i32 -> vector<4x256xf32>
    %435 = vector.extract_strided_slice %0 {offsets = [5, 0], sizes = [1, 256], strides = [1, 1]} : vector<9x256xf32> to vector<1x256xf32>
    %436 = vector.broadcast %435 : vector<1x256xf32> to vector<4x256xf32>
    %437 = arith.mulf %434, %436 : vector<4x256xf32>
    %438 = vector.extract_strided_slice %398 {offsets = [0, 5], sizes = [4, 1], strides = [1, 1]} : vector<4x9xf32> to vector<4x1xf32>
    %439 = vector.broadcast %438 : vector<4x1xf32> to vector<4x256xf32>
    %440 = arith.mulf %437, %439 : vector<4x256xf32>
    %441 = arith.addf %433, %440 : vector<4x256xf32>
    %c241_i32_55 = arith.constant 241 : i32
    %442 = tpu.dynamic_rotate %357 by %c241_i32_55 dim 1 : vector<4x256xf32>, i32 -> vector<4x256xf32>
    %443 = vector.extract_strided_slice %0 {offsets = [6, 0], sizes = [1, 256], strides = [1, 1]} : vector<9x256xf32> to vector<1x256xf32>
    %444 = vector.broadcast %443 : vector<1x256xf32> to vector<4x256xf32>
    %445 = arith.mulf %442, %444 : vector<4x256xf32>
    %446 = vector.extract_strided_slice %398 {offsets = [0, 6], sizes = [4, 1], strides = [1, 1]} : vector<4x9xf32> to vector<4x1xf32>
    %447 = vector.broadcast %446 : vector<4x1xf32> to vector<4x256xf32>
    %448 = arith.mulf %445, %447 : vector<4x256xf32>
    %449 = arith.addf %441, %448 : vector<4x256xf32>
    %c240_i32_56 = arith.constant 240 : i32
    %450 = tpu.dynamic_rotate %357 by %c240_i32_56 dim 1 : vector<4x256xf32>, i32 -> vector<4x256xf32>
    %451 = vector.extract_strided_slice %0 {offsets = [7, 0], sizes = [1, 256], strides = [1, 1]} : vector<9x256xf32> to vector<1x256xf32>
    %452 = vector.broadcast %451 : vector<1x256xf32> to vector<4x256xf32>
    %453 = arith.mulf %450, %452 : vector<4x256xf32>
    %454 = vector.extract_strided_slice %398 {offsets = [0, 7], sizes = [4, 1], strides = [1, 1]} : vector<4x9xf32> to vector<4x1xf32>
    %455 = vector.broadcast %454 : vector<4x1xf32> to vector<4x256xf32>
    %456 = arith.mulf %453, %455 : vector<4x256xf32>
    %457 = arith.addf %449, %456 : vector<4x256xf32>
    %c239_i32_57 = arith.constant 239 : i32
    %458 = tpu.dynamic_rotate %357 by %c239_i32_57 dim 1 : vector<4x256xf32>, i32 -> vector<4x256xf32>
    %459 = vector.extract_strided_slice %0 {offsets = [8, 0], sizes = [1, 256], strides = [1, 1]} : vector<9x256xf32> to vector<1x256xf32>
    %460 = vector.broadcast %459 : vector<1x256xf32> to vector<4x256xf32>
    %461 = arith.mulf %458, %460 : vector<4x256xf32>
    %462 = vector.extract_strided_slice %398 {offsets = [0, 8], sizes = [4, 1], strides = [1, 1]} : vector<4x9xf32> to vector<4x1xf32>
    %463 = vector.broadcast %462 : vector<4x1xf32> to vector<4x256xf32>
    %464 = arith.mulf %461, %463 : vector<4x256xf32>
    %465 = arith.addf %457, %464 : vector<4x256xf32>
    %c0_58 = arith.constant 0 : index
    %c0_59 = arith.constant 0 : index
    %466 = vector.load %arg14[%c0_58, %c0_59] : memref<4x1xf32, #tpu.memory_space<vmem>>, vector<4x1xf32>
    %467 = vector.broadcast %466 : vector<4x1xf32> to vector<4x256xf32>
    %468 = arith.addf %465, %467 : vector<4x256xf32>
    %469 = tpu.concatenate %357, %468 in 0 : vector<4x256xf32>, vector<4x256xf32> -> vector<8x256xf32>
    %470 = arith.addf %2, %469 : vector<8x256xf32>
    %c0_60 = arith.constant 0 : index
    %c0_61 = arith.constant 0 : index
    %c0_62 = arith.constant 0 : index
    %471 = vector.load %arg15[%c0_60, %c0_61, %c0_62] : memref<1x8x256xf32, #tpu.memory_space<vmem>>, vector<1x8x256xf32>
    %472 = vector.shape_cast %471 : vector<1x8x256xf32> to vector<8x256xf32>
    %473 = vector.shape_cast %470 : vector<8x256xf32> to vector<1x8x256xf32>
    tpu.vector_store %arg15[%c0_60, %c0_61, %c0_62], %473 {strides = array<i32>} : memref<1x8x256xf32, #tpu.memory_space<vmem>>, vector<1x8x256xf32>,
    return
  }
  func.func @transform_0(%arg0: i32) -> (i32, i32) {
    %c0_i32 = arith.constant 0 : i32
    %c0_i32_0 = arith.constant 0 : i32
    %c0_i32_1 = arith.constant 0 : i32
    return %c0_i32, %c0_i32_0 : i32, i32
  }
  func.func @transform_1(%arg0: i32) -> (i32, i32, i32) {
    %c0_i32 = arith.constant 0 : i32
    %c0_i32_0 = arith.constant 0 : i32
    %c0_i32_1 = arith.constant 0 : i32
    return %arg0, %c0_i32, %c0_i32_0 : i32, i32, i32
  }
  func.func @transform_2(%arg0: i32) -> (i32, i32) {
    %c0_i32 = arith.constant 0 : i32
    %c0_i32_0 = arith.constant 0 : i32
    %c0_i32_1 = arith.constant 0 : i32
    return %c0_i32, %c0_i32_0 : i32, i32
  }
  func.func @transform_3(%arg0: i32) -> (i32, i32, i32) {
    %c0_i32 = arith.constant 0 : i32
    %c0_i32_0 = arith.constant 0 : i32
    %c0_i32_1 = arith.constant 0 : i32
    %c0_i32_2 = arith.constant 0 : i32
    return %c0_i32, %c0_i32_0, %c0_i32_1 : i32, i32, i32
  }
  func.func @transform_4(%arg0: i32) -> (i32, i32) {
    %c0_i32 = arith.constant 0 : i32
    %c0_i32_0 = arith.constant 0 : i32
    %c0_i32_1 = arith.constant 0 : i32
    return %c0_i32, %c0_i32_0 : i32, i32
  }
  func.func @transform_5(%arg0: i32) -> (i32, i32) {
    %c0_i32 = arith.constant 0 : i32
    %c0_i32_0 = arith.constant 0 : i32
    %c0_i32_1 = arith.constant 0 : i32
    return %c0_i32, %c0_i32_0 : i32, i32
  }
  func.func @transform_6(%arg0: i32) -> (i32, i32, i32) {
    %c0_i32 = arith.constant 0 : i32
    %c0_i32_0 = arith.constant 0 : i32
    %c0_i32_1 = arith.constant 0 : i32
    %c0_i32_2 = arith.constant 0 : i32
    return %c0_i32, %c0_i32_0, %c0_i32_1 : i32, i32, i32
  }
  func.func @transform_7(%arg0: i32) -> (i32, i32) {
    %c0_i32 = arith.constant 0 : i32
    %c0_i32_0 = arith.constant 0 : i32
    %c0_i32_1 = arith.constant 0 : i32
    return %c0_i32, %c0_i32_0 : i32, i32
  }
  func.func @transform_8(%arg0: i32) -> (i32, i32) {
    %c0_i32 = arith.constant 0 : i32
    %c0_i32_0 = arith.constant 0 : i32
    %c0_i32_1 = arith.constant 0 : i32
    return %c0_i32, %c0_i32_0 : i32, i32
  }
  func.func @transform_9(%arg0: i32) -> (i32, i32, i32) {
    %c0_i32 = arith.constant 0 : i32
    %c0_i32_0 = arith.constant 0 : i32
    %c0_i32_1 = arith.constant 0 : i32
    %c0_i32_2 = arith.constant 0 : i32
    return %c0_i32, %c0_i32_0, %c0_i32_1 : i32, i32, i32
  }
  func.func @transform_10(%arg0: i32) -> (i32, i32) {
    %c0_i32 = arith.constant 0 : i32
    %c0_i32_0 = arith.constant 0 : i32
    %c0_i32_1 = arith.constant 0 : i32
    return %c0_i32, %c0_i32_0 : i32, i32
  }
  func.func @transform_11(%arg0: i32) -> (i32, i32) {
    %c0_i32 = arith.constant 0 : i32
    %c0_i32_0 = arith.constant 0 : i32
    %c0_i32_1 = arith.constant 0 : i32
    return %c0_i32, %c0_i32_0 : i32, i32
  }
  func.func @transform_12(%arg0: i32) -> (i32, i32, i32) {
    %c0_i32 = arith.constant 0 : i32
    %c0_i32_0 = arith.constant 0 : i32
    %c0_i32_1 = arith.constant 0 : i32
    %c0_i32_2 = arith.constant 0 : i32
    return %c0_i32, %c0_i32_0, %c0_i32_1 : i32, i32, i32
  }
  func.func @transform_13(%arg0: i32) -> (i32, i32) {
    %c0_i32 = arith.constant 0 : i32
    %c0_i32_0 = arith.constant 0 : i32
    %c0_i32_1 = arith.constant 0 : i32
    return %c0_i32, %c0_i32_0 : i32, i32
  }
  func.func @transform_14(%arg0: i32) -> (i32, i32, i32) {
    %c0_i32 = arith.constant 0 : i32
    %c0_i32_0 = arith.constant 0 : i32
    %c0_i32_1 = arith.constant 0 : i32
    return %arg0, %c0_i32, %c0_i32_0 : i32, i32, i32
  }
}

</mosaic_0001>

<bundles_post_ra>
// kernel: tpu_custom_call.1
= control target key start
LH: loop header
LB: loop body
LE: loop exit
PB: predicated region body
PF: predicated region fallthrough
CT: control target
= control target key end

     0   :  { %s2633_s0 = inlined_call_operand.vmem [shape: f32[9,256], index: 0, kind: input, shape index: {}]   ;;  %s2634_s1 = inlined_call_operand.vmem [shape: f32[2,8,256], index: 1, kind: input, shape index: {}]   ;;  %s2635_s2 = inlined_call_operand.vmem [shape: f32[9,4], index: 2, kind: input, shape index: {}]   ;;  %s2636_s3 = inlined_call_operand.vmem [shape: f32[4,8,8], index: 3, kind: input, shape index: {}]   ;;  %s2637_s4 = inlined_call_operand.vmem [shape: f32[8,1], index: 4, kind: input, shape index: {}]   ;;  %s2638_s5 = inlined_call_operand.vmem [shape: f32[9,4], index: 5, kind: input, shape index: {}]   ;;  %s2639_s6 = inlined_call_operand.vmem [shape: f32[4,8,9], index: 6, kind: input, shape index: {}]   ;;  %s2640_s7 = inlined_call_operand.vmem [shape: f32[8,1], index: 7, kind: input, shape index: {}]   ;;  %s2641_s8 = inlined_call_operand.vmem [shape: f32[17,4], index: 8, kind: input, shape index: {}]   ;;  %s2642_s9 = inlined_call_operand.hbm [shape: f32[4,4,16], index: 9, kind: input, shape index: {}]   ;;  %s2643_s10 = inlined_call_operand.vmem [shape: f32[4,1], index: 10, kind: input, shape index: {}]   ;;  %s2644_s11 = inlined_call_operand.vmem [shape: f32[5,4], index: 11, kind: input, shape index: {}]   ;;  %s2645_s12 = inlined_call_operand.vmem [shape: f32[4,4,9], index: 12, kind: input, shape index: {}]   ;;  %s2646_s13 = inlined_call_operand.vmem [shape: f32[4,1], index: 13, kind: input, shape index: {}]   ;;  %s2647_s14 = inlined_call_operand.hbm [shape: f32[2,8,256], index: 14, kind: output, shape index: {}]  }
   0x1   :  { %2673 = sst [smem:[#allocation12_spill]] %s2634_s1 }
   0x2   :  { %2674 = sst [smem:[#allocation13_spill]] %s2635_s2 }
   0x3   :  { %2675 = sst [smem:[#allocation14_spill]] %s2636_s3 }
   0x4   :  { %2676 = sst [smem:[#allocation15_spill]] %s2637_s4 }
   0x5   :  { %19 = vsyncpa [#allocation3], 0 }
   0x6   :  { %20 = vsyncpa [#allocation4], 0 }
   0x7   :  { %22 = vsyncpa [#allocation4 + $0x1], 0  ;;  %s1961_s29 = smov 0   ;;  %s1963_s30 = smov 0  }
   0x8   :  { %s1965_s15 = smov 0   ;;  %s1967_s16 = smov 0  }
   0x9 LB: > { %2677 = sst [smem:[#allocation8_spill]] %s1850_s15  ;;  %s1982_s17 = sadd.s32 4294967295, %s1854_s16   ;;  %s1854_s16 = sphi %s1967_s16, %s2704_s16   ;;  %s1850_s15 = sphi %s1965_s15, %s2706_s15   ;;  %s1846_s30 = sphi %s1963_s30, %s2708_s30   ;;  %s1842_s29 = sphi %s1961_s29, %s2707_s29  }
   0xa   : > { %s1566_s18 = sadd.s32 4294967294, %s1854_s16   ;;  %s1986_s19 = sadd.s32 1, %s1854_s16  }
   0xb   : > { %2678 = sst [smem:[#allocation9_spill]] %s1986_s19  ;;  %s334_s20 = sadd.s32 1, %s1850_s15 }
   0xc   : > { %s331_s21 = ssub.s32 %s1854_s16, %s1986_s19  ;;  %p344_p0 = scmp.ne.s32.totalorder %s1850_s15, %s1846_s30 }
   0xd   : > { %p332_p1 = scmp.eq.s32.totalorder %s331_s21, 0  ;;  %p345_p2 = scmp.eq.s32.totalorder %s1982_s17, 1 }
   0xe   : > { %p350_p3 = scmp.ne.s32.totalorder %s1846_s30, %s1842_s29  ;;  %p351_p4 = scmp.eq.s32.totalorder %s1566_s18, 1 }
   0xf   : > { %s1997_s22 = scalar_select %p332_p1, %s1850_s15, %s334_s20  }
  0x10   : > { %p1999_p5 = por %p345_p2, %p344_p0  ;;  %p2003_p6 = por %p351_p4, %p350_p3 }
  0x11   : > { %2679 = sst [smem:[#allocation10_spill]] %s1997_s22  ;;  %p1567_p7 = scmp.ge.s32.totalorder %s1854_s16, 1 }
  0x12   : > { %s2680_s23 = scalar_select %p1999_p5, 1, 0 }
  0x13   : > { %s2681_s24 = scalar_select %p2003_p6, 1, 0 }
  0x14   : > { %p358_p8 = scmp.lt.s32.totalorder %s1854_s16, 3  ;;  %p2652_p9 = scmp.eq.s32.totalorder %s1982_s17, 0 }
  0x15   : > { %2682 = sst [smem:[#allocation11_spill]] %s2681_s24  ;;  %s1856_s26 = smov [#allocation2]  }
  0x16   : > { %p2010_p10 = pnand %p1567_p7, %p358_p8  ;;  %s394_s27 = sshll.u32 %s1856_s26, 4  ;;  %s395_s27 = int_to_ptr.vmem [resolvable:$true] %s394_s27 }
  0x17   : > { %s1760_s21 = scalar_lea.hbm %s2642_s9, 256 }
  0x18   : > { %s2683_s25 = scalar_select %p2010_p10, 1, 0 }
  0x19   : > { %p1626_p11 = pneg %p2010_p10  ;;  %p1761_p13 = scmp.ne.s32.totalorder %s2642_s9, %s1760_s21 }
  0x1a   : > { %p1767_p3 = scmp.lt.u32.totalorder %s1760_s21, %s2642_s9 }
  0x1b   : > { %p2018_p12 = pnand %p2652_p9, %p1626_p11 }
  0x1d   : > { %p1762_p0 = pneg %p2018_p12 }
  0x1f   : > { %p1763_p1 = pnand %p1762_p0, %p1761_p13 }
  0x21   : > { %p1764_p2 = pneg %p1763_p1 }
  0x23   : > { %p1769_p4 = pnand %p1767_p3, %p1764_p2 }
  0x25   : > { %1772 = shalt.err (!%p1769_p4)
}
  0x26   : > { %s1773_s24 = scalar_lea.vmem %s395_s27, 256  ;;  %p1781_p9 = scmp.lt.s32.totalorder %s395_s27, %s395_s27 }
  0x27   : > { %p1774_p7 = scmp.ne.s32.totalorder %s395_s27, %s1773_s24  ;;  %p1782_p6 = scmp.lt.s32.totalorder %s1773_s24, %s1773_s24 }
  0x29   : > { %p1776_p8 = pnand %p1774_p7, %p1762_p0  ;;  %p1783_p5 = por %p1782_p6, %p1781_p9 }
  0x2b   : > { %p1777_p11 = pneg %p1776_p8 }
  0x2d   : > { %p1784_p10 = pnand %p1783_p5, %p1777_p11 }
  0x2f   : > { %1787 = shalt.err (!%p1784_p10)
}
  0x30   : > { %s1857_s15 = smov 64   ;;  %s1858_s22 = smov 4  }
  0x31   : > { %1629 = dma.hbm_to_vmem [thread:$0]  (!%p2018_p12), %s2642_s9, 256, %s395_s27, [#allocation3], %s1857_s15, %s1857_s15, %s1858_s22  }
  0x32   : > { %p2685_p13 = scmp.ne.s32.totalorder %s2683_s25, 0 }
  0x33   : > { %p2686_p1 = scmp.eq.s32.totalorder (!%p2685_p13), %s1982_s17, 0 }
  0x34   : > { %430 = sbr.rel (%p2685_p13) target bundleno = 2235 (0x8bb), region = 76 }
  0x3b   : > { %1833 = dma.done.wait (%p2686_p1), [#allocation3], 256   ;;  %p2687_p0 = pmov %p2686_p1 }
  0x3c   : > { %p476_p5 = scmp.lt.s32.totalorder %s1982_s17, 1  ;;  %s2688_s1 = sld [smem:[#allocation12_spill]]  ;;  %vm494_vm0 = vcmask 31744   ;;  %v1862_v20 = vmov 5   ;;  %v1863_v21 = vmov 0   ;;  %v1864_v41 = vmov 1  }
  0x3d   : > { %1835 = vsyncadd (%p2687_p0), [#allocation3], 4294967040  ;;  %s2689_s2 = sld [smem:[#allocation13_spill]]  ;;  %s2657_s18 = smov 126   ;;  %1703 = vset.pattern.permute.xlu0 %v1862_v20  ;;  %1698 = vset.pattern.permute.xlu1 %v1863_v21  ;;  %v1865_v42 = vmov 2   ;;  %v1866_v43 = vmov 3   ;;  %v544_v47 = vlaneseq }
  0x3e   : > { %s477_s19 = scalar_select %p476_p5, %s1982_s17, 1  ;;  %v1867_v44 = vmov 4   ;;  %v1868_v45 = vmov 6   ;;  %v1869_v46 = vmov 7   ;;  %vm1271_vm9 = vcmask 1043456  }
  0x3f   : > { %s2659_s20 = smov 127   ;;  %s2690_s3 = sld [smem:[#allocation14_spill]]  ;;  %v545_v49 = vshrl.u32 %v544_v47, 7  ;;  %vm1279_vm10 = vcmask 27648  }
  0x40   : > { %s1586_s24 = sshll.u32 %s477_s19, 4  ;;  %s2655_s19 = smov 125  }
  0x41   : > { %s2691_s4 = sld [smem:[#allocation15_spill]]  ;;  %v2095_v50 = vsub.s32 1, %v545_v49  ;;  %v2097_v52 = vsub.s32 0, %v545_v49  ;;  %v2099_v53 = vsub.s32 2, %v545_v49  ;;  %v2105_v56 = vsub.s32 3, %v545_v49  ;;  %s2692_s28 = smov 127  }
  0x42   : > { %s2049_s26 = scalar_lea.vmem %s2688_s1, %s1586_s24  ;;  %v2115_v62 = vsub.s32 4, %v545_v49  ;;  %s2667_s1 = smov 17  }
  0x43   : > { %v2052_v0 = vld [vmem:[%s2049_s26] sm:$0xff]  ;;  %v2055_v1 = vld [vmem:[%s2049_s26 + $0x8] sm:$0xff]  ;;  %s2671_s25 = smov 113   ;;  %s2669_s27 = smov 112  }
  0x44   : > { %v489_v2 = vadd.f32 %v2055_v1, %v2052_v0  ;;  %v487_v3 = vld [vmem:[%s2689_s2] sm:$0xff]  ;;  %v488_v13 = vld [vmem:[%s2689_s2 + $0x8] sm:$0x1]  ;;  %v561_v54 = vrot.slane %v2052_v0, %v2095_v50  ;;  %v565_v55 = vrot.slane %v2055_v1, %v2095_v50  ;;  %v547_v58 = vrot.slane %v2052_v0, %v2097_v52  ;;  %s2665_s22 = smov 16   ;;  %p2701_p9 = scmp.ne.s32.totalorder %s2680_s23, 0 }
  0x45   : > { %v509_v25 = vld [vmem:[%s2690_s3] sm:$0xff]  ;;  %v510_v27 = vld [vmem:[%s2690_s3 + $0x8] sm:$0xff]  ;;  %v511_v29 = vld [vmem:[%s2690_s3 + $0x10] sm:$0xff]  ;;  %v551_v59 = vrot.slane %v2055_v1, %v2097_v52  ;;  %v577_v60 = vrot.slane %v2052_v0, %v2099_v53  ;;  %v581_v61 = vrot.slane %v2055_v1, %v2099_v53 }
  0x46   : > { %490 = vadd.xlane.f32.xlu0 %v489_v2  ;;  %v512_v33 = vld [vmem:[%s2690_s3 + $0x18] sm:$0xff]  ;;  %s1876_s3 = smov 111  }
  0x47   : > { %v666_v40 = vld [vmem:[%s2691_s4] sm:$0xff] }
  0xd3   : > { %v491_v4 = vpop.xlane.xlu0 %490 }
  0xd4   : > { %v492_v5 = vmul.f32 0.00390625, %v491_v4  ;;  %v597_v4 = vrot.slane %v2055_v1, %v2105_v56 }
  0xd6   : > { %v493_v6 = vmul.f32 %v492_v5, %v487_v3  ;;  %v593_v3 = vrot.slane %v2052_v0, %v2105_v56 }
  0xd8   : > { %v495_v7 = vsel %vm494_vm0, %v493_v6, 0.0 }
  0xd9   : > { %v496_v8 = vrot.slane %v495_v7, 4 }
  0xdb   : > { %v497_v9 = vadd.f32 %v496_v8, %v495_v7 }
  0xdd   : > { %v498_v10 = vrot.slane %v497_v9, 2 }
  0xdf   : > { %v499_v11 = vadd.f32 %v498_v10, %v497_v9  ;;  %v2121_v10 = vsub.s32 5, %v545_v49 }
  0xe1   : > { %v500_v12 = vrot.slane %v499_v11, 1 }
  0xe3   : > { %v501_v14 = vadd.f32 %v500_v12, %v499_v11  ;;  %v609_v11 = vrot.slane %v2052_v0, %v2115_v62  ;;  %v613_v12 = vrot.slane %v2055_v1, %v2115_v62 }
  0xe5   : > { %v502_v15 = vadd.f32 %v501_v14, %v488_v13 }
  0xe7   : > { %v1575_v16 = vmul.f32 -1.442695, %v502_v15 }
  0xe9   : > { %1742 = vpow2.f32 %v1575_v16 }
  0xf3   : > { %v1743_v17 = vpop.eup %1742 }
  0xf4   : > { %v506_v18 = vadd.f32 1.0, %v1743_v17 }
  0xf6   : > { %1744 = vrcp.f32 %v506_v18 }
 0x100   : > { %v1745_v19 = vpop.eup %1744 }
 0x101   : > { %525 = vrot.lane.b32.xlu1 %v1745_v19, %s2657_s18  ;;  %518 = vrot.lane.b32.xlu0 %v1745_v19, %s2659_s20  ;;  %1588 = vpush %v1745_v19  ;;  %s2661_s20 = smov 1  }
 0x105   : > { %532 = vrot.lane.b32.xlu1 %v1745_v19, %s2655_s19  ;;  %v2127_v19 = vsub.s32 6, %v545_v49  ;;  %s2693_s19 = smov 126  }
 0x132   : > { %s1589_s24 = spop %1588 }
 0x133   : > { %v515_v26 = vstv %s1589_s24 }
 0x134   : > { %v517_v30 = vmul.f32 %v515_v26, %v509_v25 }
 0x173   : > { %v526_v22 = vpop.permute.xlu1 %525  ;;  %v519_v23 = vpop.permute.xlu0 %518 }
 0x174   : > { %1590 = vpush %v519_v23  ;;  %v629_v23 = vrot.slane %v2055_v1, %v2121_v10 }
 0x175   : > { %1592 = vpush %v526_v22  ;;  %v625_v22 = vrot.slane %v2052_v0, %v2121_v10 }
 0x177   : > { %v533_v24 = vpop.permute.xlu1 %532 }
 0x178   : > { %1594 = vpush %v533_v24 }
 0x1a5   : > { %s1591_s15 = spop %1590 }
 0x1a6   : > { %v521_v28 = vstv %s1591_s15  ;;  %s1593_s18 = spop %1592  ;;  %s2694_s15 = smov 125  }
 0x1a7   : > { %v523_v31 = vmul.f32 %v521_v28, %v510_v27  ;;  %v528_v32 = vstv %s1593_s18  ;;  %s2663_s18 = smov 15  }
 0x1a8   : > { %v530_v35 = vmul.f32 %v528_v32, %v511_v29 }
 0x1a9   : > { %v524_v34 = vadd.f32 %v523_v31, %v517_v30  ;;  %s1595_s24 = spop %1594  ;;  %v2133_v30 = vsub.s32 7, %v545_v49 }
 0x1aa   : > { %v535_v36 = vstv %s1595_s24 }
 0x1ab   : > { %v531_v37 = vadd.f32 %v530_v35, %v524_v34  ;;  %v537_v38 = vmul.f32 %v535_v36, %v512_v33  ;;  %v641_v33 = vrot.slane %v2052_v0, %v2127_v19  ;;  %v645_v34 = vrot.slane %v2055_v1, %v2127_v19 }
 0x1ad   : > { %v538_v39 = vadd.f32 %v537_v38, %v531_v37  ;;  %v657_v38 = vrot.slane %v2052_v0, %v2133_v30 }
 0x1af   : > { %619 = vperm.xlu0 %1703, %v538_v39   ;;  %541 = vperm.xlu1 %1698, %v538_v39  }
 0x1b3   : > { %1699 = vset.pattern.permute.xlu1 %v1864_v41  ;;  %1706 = vset.pattern.permute.xlu0 %v1863_v21 }
 0x1b4   : > { %555 = vperm.xlu1 %1699, %v538_v39   ;;  %669 = vperm.xlu0 %1706, %v666_v40  }
 0x1b8   : > { %1700 = vset.pattern.permute.xlu1 %v1865_v42 }
 0x1b9   : > { %571 = vperm.xlu1 %1700, %v538_v39  }
 0x1bd   : > { %1701 = vset.pattern.permute.xlu1 %v1866_v43 }
 0x1be   : > { %587 = vperm.xlu1 %1701, %v538_v39  }
 0x1c2   : > { %1702 = vset.pattern.permute.xlu1 %v1867_v44 }
 0x1c3   : > { %603 = vperm.xlu1 %1702, %v538_v39  }
 0x1c7   : > { %1704 = vset.pattern.permute.xlu1 %v1868_v45 }
 0x1c8   : > { %635 = vperm.xlu1 %1704, %v538_v39  }
 0x1cc   : > { %1705 = vset.pattern.permute.xlu1 %v1869_v46 }
 0x1cd   : > { %651 = vperm.xlu1 %1705, %v538_v39   ;;  %v661_v39 = vrot.slane %v2055_v1, %v2133_v30 }
 0x1d1   : > { %1712 = vset.pattern.permute.xlu1 %v1868_v45 }
 0x22e   : > { %v542_v48 = vpop.permute.xlu1 %541  ;;  %v620_v29 = vpop.permute.xlu0 %619 }
 0x22f   : > { %v552_v5 = vmul.f32 %v547_v58, %v542_v48  ;;  %v553_v6 = vmul.f32 %v551_v59, %v542_v48  ;;  %v630_v35 = vmul.f32 %v625_v22, %v620_v29  ;;  %v631_v36 = vmul.f32 %v629_v23, %v620_v29  ;;  %v698_v29 = vld [vmem:[%s2639_s6 + $0x8] sm:$0xff] }
 0x233   : > { %v556_v51 = vpop.permute.xlu1 %555 }
 0x234   : > { %v566_v63 = vmul.f32 %v561_v54, %v556_v51  ;;  %v567_v2 = vmul.f32 %v565_v55, %v556_v51 }
 0x236   : > { %v568_v13 = vadd.f32 %v566_v63, %v552_v5  ;;  %v569_v14 = vadd.f32 %v567_v2, %v553_v6  ;;  %v676_v5 = vld [vmem:[%s2638_s5] sm:$0xff] }
 0x238   : > { %v572_v57 = vpop.permute.xlu1 %571 }
 0x239   : > { %v582_v7 = vmul.f32 %v577_v60, %v572_v57  ;;  %v583_v8 = vmul.f32 %v581_v61, %v572_v57  ;;  %v670_v60 = vpop.permute.xlu0 %669 }
 0x23b   : > { %v584_v17 = vadd.f32 %v582_v7, %v568_v13  ;;  %v585_v18 = vadd.f32 %v583_v8, %v569_v14 }
 0x23d   : > { %v588_v9 = vpop.permute.xlu1 %587 }
 0x23e   : > { %v598_v15 = vmul.f32 %v593_v3, %v588_v9  ;;  %v599_v16 = vmul.f32 %v597_v4, %v588_v9 }
 0x240   : > { %v600_v25 = vadd.f32 %v598_v15, %v584_v17  ;;  %v601_v26 = vadd.f32 %v599_v16, %v585_v18  ;;  %v677_v16 = vld [vmem:[%s2638_s5 + $0x8] sm:$0x1] }
 0x242   : > { %v604_v24 = vpop.permute.xlu1 %603 }
 0x243   : > { %v614_v27 = vmul.f32 %v609_v11, %v604_v24  ;;  %v615_v28 = vmul.f32 %v613_v12, %v604_v24 }
 0x245   : > { %v616_v31 = vadd.f32 %v614_v27, %v600_v25  ;;  %v617_v32 = vadd.f32 %v615_v28, %v601_v26 }
 0x247   : > { %v636_v37 = vpop.permute.xlu1 %635  ;;  %v632_v40 = vadd.f32 %v630_v35, %v616_v31  ;;  %v633_v48 = vadd.f32 %v631_v36, %v617_v32  ;;  %v697_v32 = vld [vmem:[%s2639_s6] sm:$0xff] }
 0x248   : > { %v646_v49 = vmul.f32 %v641_v33, %v636_v37  ;;  %v647_v51 = vmul.f32 %v645_v34, %v636_v37  ;;  %v699_v34 = vld [vmem:[%s2639_s6 + $0x10] sm:$0xff] }
 0x24a   : > { %v648_v55 = vadd.f32 %v646_v49, %v632_v40  ;;  %v649_v57 = vadd.f32 %v647_v51, %v633_v48 }
 0x24c   : > { %v652_v54 = vpop.permute.xlu1 %651 }
 0x24d   : > { %v662_v58 = vmul.f32 %v657_v38, %v652_v54  ;;  %v663_v59 = vmul.f32 %v661_v39, %v652_v54  ;;  %v700_v39 = vld [vmem:[%s2639_s6 + $0x18] sm:$0xff] }
 0x24f   : > { %v664_v61 = vadd.f32 %v662_v58, %v648_v55  ;;  %v665_v63 = vadd.f32 %v663_v59, %v649_v57  ;;  %v1877_v55 = vmov 8   ;;  %v936_v57 = vld [vmem:[%s2640_s7] sm:$0xff] }
 0x251   : > { %v672_v2 = vadd.f32 %v670_v60, %v664_v61  ;;  %v673_v3 = vadd.f32 %v670_v60, %v665_v63 }
 0x253   : > { %v2143_v4 = vmax.f32 %v672_v2, 0.0  ;;  %v2145_v0 = vmax.f32 %v673_v3, 0.0 }
 0x255   : > { %v678_v1 = vadd.f32 %v2145_v0, %v2143_v4 }
 0x257   : > { %679 = vadd.xlane.f32.xlu1 %v678_v1 }
 0x268   : > { %727 = vrot.lane.b32.xlu1 %v2143_v4, %s2667_s1 }
 0x26c   : > { %778 = vrot.lane.b32.xlu1 %v2143_v4, %s2663_s18 }
 0x270   : > { %780 = vrot.lane.b32.xlu1 %v2145_v0, %s2663_s18 }
 0x274   : > { %803 = vrot.lane.b32.xlu1 %v2143_v4, %s2661_s20 }
 0x278   : > { %805 = vrot.lane.b32.xlu1 %v2145_v0, %s2661_s20  ;;  %s1587_s20 = sshll.u32 %s1982_s17, 8 }
 0x27c   : > { %836 = vrot.lane.b32.xlu1 %v2143_v4, %s2692_s28 }
 0x280   : > { %863 = vrot.lane.b32.xlu1 %v2145_v0, %s2671_s25 }
 0x284   : > { %886 = vrot.lane.b32.xlu1 %v2143_v4, %s2669_s27  ;;  %s2696_s27 = smov 17  }
 0x2e4   : > { %v680_v6 = vpop.xlane.xlu1 %679 }
 0x2e5   : > { %v2168_v7 = vmul.f32 0.00390625, %v680_v6 }
 0x2e7   : > { %v682_v8 = vmul.f32 %v2168_v7, %v676_v5 }
 0x2e8   : > { %v728_v58 = vpop.permute.xlu1 %727 }
 0x2e9   : > { %v683_v9 = vsel %vm494_vm0, %v682_v8, 0.0 }
 0x2ea   : > { %v684_v11 = vrot.slane %v683_v9, 4 }
 0x2ec   : > { %v685_v12 = vadd.f32 %v684_v11, %v683_v9  ;;  %v779_v59 = vpop.permute.xlu1 %778 }
 0x2ee   : > { %v686_v13 = vrot.slane %v685_v12, 2 }
 0x2f0   : > { %v687_v14 = vadd.f32 %v686_v13, %v685_v12  ;;  %v781_v61 = vpop.permute.xlu1 %780  ;;  %v2219_v12 = vand.u32 127, %v544_v47 }
 0x2f2   : > { %v688_v15 = vrot.slane %v687_v14, 1  ;;  %vm757_vm1 = vcmp.lt.s32.totalorder %v2219_v12, 16  ;;  %vm782_vm2 = vcmp.lt.s32.totalorder %v2219_v12, 15  ;;  %vm733_vm3 = vcmp.lt.s32.totalorder %v2219_v12, 17 }
 0x2f3   : > { %vm807_vm4 = vcmp.lt.s32.totalorder %v2219_v12, 1  ;;  %vm840_vm5 = vcmp.lt.s32.totalorder %v2219_v12, 127  ;;  %vm865_vm6 = vcmp.lt.s32.totalorder %v2219_v12, 113  ;;  %vm890_vm7 = vcmp.lt.s32.totalorder %v2219_v12, 112 }
 0x2f4   : > { %v689_v17 = vadd.f32 %v688_v15, %v687_v14  ;;  %v804_v2 = vpop.permute.xlu1 %803  ;;  %v2226_v15 = vld [vmem:[%s2633_s0] sm:$0xff]  ;;  %vm915_vm8 = vcmp.lt.s32.totalorder %v2219_v12, 111 }
 0x2f5   : > { %v2237_v47 = vrot.slane %v2226_v15, %v2099_v53 }
 0x2f6   : > { %v690_v18 = vadd.f32 %v689_v17, %v677_v16  ;;  %v2231_v16 = vld [vmem:[%s2633_s0 + $0x8] sm:$0xff]  ;;  %v2242_v17 = vrot.slane %v2226_v15, %v2095_v50 }
 0x2f8   : > { %v1576_v22 = vmul.f32 -1.442695, %v690_v18  ;;  %v806_v1 = vpop.permute.xlu1 %805  ;;  %v2246_v18 = vrot.slane %v2231_v16, %v2095_v50 }
 0x2fa   : > { %1746 = vpow2.f32 %v1576_v22 }
 0x2fc   : > { %v837_v6 = vpop.permute.xlu1 %836 }
 0x300   : > { %v864_v9 = vpop.permute.xlu1 %863 }
 0x304   : > { %v1747_v23 = vpop.eup %1746  ;;  %v2221_v14 = vpop.permute.xlu1 %886 }
 0x305   : > { %v694_v24 = vadd.f32 1.0, %v1747_v23 }
 0x307   : > { %1748 = vrcp.f32 %v694_v24  ;;  %v2252_v24 = vrot.slane %v2231_v16, %v2099_v53 }
 0x311   : > { %v1749_v25 = vpop.eup %1748 }
 0x312   : > { %706 = vrot.lane.b32.xlu0 %v1749_v25, %s2692_s28  ;;  %1596 = vpush %v1749_v25 }
 0x316   : > { %713 = vrot.lane.b32.xlu0 %v1749_v25, %s2693_s19 }
 0x31a   : > { %720 = vrot.lane.b32.xlu0 %v1749_v25, %s2694_s15 }
 0x31e   : > { %729 = vrot.lane.b32.xlu0 %v2145_v0, %s2667_s1 }
 0x322   : > { %753 = vrot.lane.b32.xlu0 %v2143_v4, %s2665_s22 }
 0x326   : > { %755 = vrot.lane.b32.xlu0 %v2145_v0, %s2665_s22  ;;  %s2697_s22 = smov 15  }
 0x32a   : > { %838 = vrot.lane.b32.xlu0 %v2145_v0, %s2692_s28 }
 0x32e   : > { %861 = vrot.lane.b32.xlu0 %v2143_v4, %s2671_s25 }
 0x343   : > { %s1597_s24 = spop %1596 }
 0x344   : > { %v703_v33 = vstv %s1597_s24  ;;  %s2698_s24 = smov 1  }
 0x345   : > { %v705_v37 = vmul.f32 %v703_v33, %v697_v32  ;;  %v2273_v32 = vrot.slane %v2226_v15, %v2105_v56  ;;  %v2277_v33 = vrot.slane %v2231_v16, %v2105_v56 }
 0x384   : > { %v707_v26 = vpop.permute.xlu0 %706 }
 0x385   : > { %1598 = vpush %v707_v26 }
 0x388   : > { %v714_v27 = vpop.permute.xlu0 %713 }
 0x389   : > { %1600 = vpush %v714_v27  ;;  %v783_v27 = vsel %vm782_vm2, %v779_v59, %v781_v61 }
 0x38c   : > { %v721_v28 = vpop.permute.xlu0 %720 }
 0x38d   : > { %1602 = vpush %v721_v28  ;;  %v784_v28 = vsel %vm782_vm2, %v781_v61, %v779_v59 }
 0x390   : > { %v730_v60 = vpop.permute.xlu0 %729 }
 0x394   : > { %v754_v63 = vpop.permute.xlu0 %753 }
 0x398   : > { %v756_v3 = vpop.permute.xlu0 %755 }
 0x399   : > { %v758_v25 = vsel %vm757_vm1, %v754_v63, %v756_v3  ;;  %v759_v26 = vsel %vm757_vm1, %v756_v3, %v754_v63  ;;  %v2298_v63 = vrot.slane %v2226_v15, %v2121_v10 }
 0x39c   : > { %v839_v5 = vpop.permute.xlu0 %838 }
 0x3a0   : > { %v862_v8 = vpop.permute.xlu0 %861 }
 0x3b6   : > { %s1599_s21 = spop %1598 }
 0x3b7   : > { %v709_v31 = vstv %s1599_s21 }
 0x3b8   : > { %v711_v35 = vmul.f32 %v709_v31, %v698_v29  ;;  %v2265_v29 = vrot.slane %v2226_v15, %v2097_v52  ;;  %v2269_v31 = vrot.slane %v2231_v16, %v2097_v52 }
 0x3ba   : > { %s1601_s2 = spop %1600  ;;  %v712_v40 = vadd.f32 %v711_v35, %v705_v37  ;;  %v735_v35 = vsel %vm733_vm3, %v730_v60, %v728_v58  ;;  %v809_v37 = vsel %vm807_vm4, %v806_v1, %v804_v2 }
 0x3bb   : > { %v716_v36 = vstv %s1601_s2  ;;  %s2695_s2 = smov 112  }
 0x3bc   : > { %v718_v38 = vmul.f32 %v716_v36, %v699_v34  ;;  %v734_v34 = vsel %vm733_vm3, %v728_v58, %v730_v60  ;;  %v808_v36 = vsel %vm807_vm4, %v804_v2, %v806_v1  ;;  %v818_v60 = vmul.f32 %v2273_v32, %v809_v37 }
 0x3bd   : > { %v819_v61 = vmul.f32 %v2277_v33, %v808_v36 }
 0x3be   : > { %s1603_s18 = spop %1602  ;;  %v719_v49 = vadd.f32 %v718_v38, %v712_v40  ;;  %v768_v38 = vmul.f32 %v2242_v17, %v759_v26  ;;  %v793_v40 = vmul.f32 %v2237_v47, %v784_v28  ;;  %v841_v26 = vsel %vm840_vm5, %v837_v6, %v839_v5 }
 0x3bf   : > { %v723_v48 = vstv %s1603_s18  ;;  %v2311_v28 = vrot.slane %v2226_v15, %v2127_v19 }
 0x3c0   : > { %v725_v51 = vmul.f32 %v723_v48, %v700_v39  ;;  %v769_v39 = vmul.f32 %v2246_v18, %v758_v25  ;;  %v794_v48 = vmul.f32 %v2252_v24, %v783_v27  ;;  %v2307_v27 = vrot.slane %v2231_v16, %v2121_v10 }
 0x3c2   : > { %v726_v54 = vadd.f32 %v725_v51, %v719_v49  ;;  %v744_v51 = vmul.f32 %v2265_v29, %v735_v35 }
 0x3c4   : > { %879 = vperm.xlu1 %1712, %v726_v54   ;;  %748 = vperm.xlu0 %1706, %v726_v54  }
 0x3c8   : > { %1713 = vset.pattern.permute.xlu1 %v1869_v46  ;;  %1707 = vset.pattern.permute.xlu0 %v1864_v41 }
 0x3c9   : > { %904 = vperm.xlu1 %1713, %v726_v54   ;;  %771 = vperm.xlu0 %1707, %v726_v54  }
 0x3cd   : > { %888 = vrot.lane.b32.xlu1 %v2145_v0, %s2695_s2  ;;  %1708 = vset.pattern.permute.xlu0 %v1865_v42 }
 0x3ce   : > { %796 = vperm.xlu0 %1708, %v726_v54   ;;  %1718 = vset.pattern.permute.xlu1 %v1866_v43 }
 0x3d1   : > { %913 = vrot.lane.b32.xlu1 %v2145_v0, %s1876_s3 }
 0x3d2   : > { %1709 = vset.pattern.permute.xlu0 %v1866_v43 }
 0x3d3   : > { %821 = vperm.xlu0 %1709, %v726_v54  }
 0x3d7   : > { %1710 = vset.pattern.permute.xlu0 %v1867_v44 }
 0x3d8   : > { %829 = vperm.xlu0 %1710, %v726_v54  }
 0x3dc   : > { %1711 = vset.pattern.permute.xlu0 %v1862_v20 }
 0x3dd   : > { %854 = vperm.xlu0 %1711, %v726_v54  }
 0x3e1   : > { %911 = vrot.lane.b32.xlu0 %v2143_v4, %s1876_s3 }
 0x3e2   : > { %1714 = vset.pattern.permute.xlu0 %v1877_v55 }
 0x3e5   : > { %929 = vperm.xlu0 %1714, %v726_v54   ;;  %v745_v54 = vmul.f32 %v2269_v31, %v734_v34 }
 0x3e9   : > { %1715 = vset.pattern.permute.xlu0 %v1863_v21 }
 0x3ea   : > { %939 = vperm.xlu0 %1715, %v936_v57  }
 0x443   : > { %v749_v11 = vpop.permute.xlu0 %748  ;;  %v2248_v22 = vpop.permute.xlu1 %879 }
 0x444   : > { %v751_v2 = vmul.f32 %v749_v11, %v744_v51  ;;  %v752_v3 = vmul.f32 %v749_v11, %v745_v54  ;;  %v851_v51 = vmul.f32 %v2298_v63, %v841_v26 }
 0x448   : > { %v772_v13 = vpop.permute.xlu0 %771  ;;  %v905_v59 = vpop.permute.xlu1 %904 }
 0x449   : > { %v774_v57 = vmul.f32 %v772_v13, %v768_v38  ;;  %v775_v58 = vmul.f32 %v772_v13, %v769_v39  ;;  %v842_v13 = vsel %vm840_vm5, %v839_v5, %v837_v6  ;;  %v867_v38 = vsel %vm865_vm6, %v864_v9, %v862_v8 }
 0x44a   : > { %v2319_v5 = vrot.slane %v2231_v16, %v2127_v19  ;;  %v852_v54 = vmul.f32 %v2307_v27, %v842_v13 }
 0x44b   : > { %v776_v34 = vadd.f32 %v774_v57, %v751_v2  ;;  %v777_v35 = vadd.f32 %v775_v58, %v752_v3 }
 0x44c   : > { %v889_v6 = vpop.permute.xlu1 %888 }
 0x44d   : > { %v797_v23 = vpop.permute.xlu0 %796  ;;  %v891_v2 = vsel %vm890_vm7, %v2221_v14, %v889_v6  ;;  %v892_v3 = vsel %vm890_vm7, %v889_v6, %v2221_v14  ;;  %v2350_v14 = vld [vmem:[%s2633_s0 + $0x10] ss:$0 sm:$0xff] }
 0x44e   : > { %v799_v1 = vmul.f32 %v797_v23, %v793_v40  ;;  %v800_v25 = vmul.f32 %v797_v23, %v794_v48  ;;  %v866_v23 = vsel %vm865_vm6, %v862_v8, %v864_v9  ;;  %v2328_v8 = vrot.slane %v2226_v15, %v2133_v30 }
 0x44f   : > { %v2332_v9 = vrot.slane %v2231_v16, %v2133_v30 }
 0x450   : > { %v801_v39 = vadd.f32 %v799_v1, %v776_v34  ;;  %v802_v40 = vadd.f32 %v800_v25, %v777_v35  ;;  %v901_v35 = vmul.f32 %v2328_v8, %v891_v2 }
 0x452   : > { %v822_v49 = vpop.permute.xlu0 %821 }
 0x453   : > { %v824_v36 = vmul.f32 %v822_v49, %v818_v60  ;;  %v825_v11 = vmul.f32 %v822_v49, %v819_v61  ;;  %v876_v60 = vmul.f32 %v2311_v28, %v866_v23  ;;  %v877_v61 = vmul.f32 %v2319_v5, %v867_v38  ;;  %v2355_v23 = vld [vmem:[%s2633_s0 + $0x18] ss:$0 sm:$0xff]  ;;  %v914_v38 = vpop.permute.xlu1 %913 }
 0x455   : > { %v826_v57 = vadd.f32 %v824_v36, %v801_v39  ;;  %v827_v58 = vadd.f32 %v825_v11, %v802_v40  ;;  %v882_v13 = vmul.f32 %v2248_v22, %v876_v60  ;;  %v883_v34 = vmul.f32 %v2248_v22, %v877_v61 }
 0x456   : > { %v902_v36 = vmul.f32 %v2332_v9, %v892_v3 }
 0x457   : > { %v830_v37 = vpop.permute.xlu0 %829 }
 0x458   : > { %v832_v48 = vmul.f32 %v830_v37, %v2143_v4  ;;  %v833_v49 = vmul.f32 %v830_v37, %v2145_v0 }
 0x45a   : > { %v834_v1 = vadd.f32 %v832_v48, %v826_v57  ;;  %v835_v25 = vadd.f32 %v833_v49, %v827_v58  ;;  %v908_v57 = vmul.f32 %v905_v59, %v902_v36 }
 0x45c   : > { %v855_v15 = vpop.permute.xlu0 %854 }
 0x45d   : > { %v857_v26 = vmul.f32 %v855_v15, %v851_v51  ;;  %v858_v16 = vmul.f32 %v855_v15, %v852_v54  ;;  %v907_v54 = vmul.f32 %v905_v59, %v901_v35  ;;  %v946_v59 = vld [vmem:[%s2641_s8] sm:$0xff] }
 0x45e   : > { %v949_v35 = vmul.f32 %v946_v59, %v2168_v7 }
 0x45f   : > { %v859_v11 = vadd.f32 %v857_v26, %v834_v1  ;;  %v860_v37 = vadd.f32 %v858_v16, %v835_v25 }
 0x460   : > { %v912_v22 = vpop.permute.xlu0 %911  ;;  %v950_v36 = vsel %vm494_vm0, %v949_v35, 0.0 }
 0x461   : > { %v884_v6 = vadd.f32 %v882_v13, %v859_v11  ;;  %v885_v39 = vadd.f32 %v883_v34, %v860_v37  ;;  %v916_v40 = vsel %vm915_vm8, %v912_v22, %v914_v38  ;;  %v917_v48 = vsel %vm915_vm8, %v914_v38, %v912_v22 }
 0x462   : > { %v926_v49 = vmul.f32 %v2350_v14, %v916_v40  ;;  %v927_v51 = vmul.f32 %v2355_v23, %v917_v48  ;;  %v951_v37 = vrot.slane %v950_v36, 4 }
 0x463   : > { %v909_v2 = vadd.f32 %v907_v54, %v884_v6  ;;  %v910_v3 = vadd.f32 %v908_v57, %v885_v39  ;;  %v947_v6 = vld [vmem:[%s2641_s8 + $0x8] sm:$0xff] }
 0x464   : > { %v930_v58 = vpop.permute.xlu0 %929  ;;  %v952_v38 = vadd.f32 %v951_v37, %v950_v36 }
 0x465   : > { %v932_v60 = vmul.f32 %v930_v58, %v926_v49  ;;  %v933_v61 = vmul.f32 %v930_v58, %v927_v51 }
 0x466   : > { %v953_v22 = vrot.slane %v952_v38, 2 }
 0x467   : > { %v934_v15 = vadd.f32 %v932_v60, %v909_v2  ;;  %v935_v1 = vadd.f32 %v933_v61, %v910_v3  ;;  %v948_v2 = vld [vmem:[%s2641_s8 + $0x10] sm:$0x1] }
 0x468   : > { %v954_v49 = vadd.f32 %v953_v22, %v952_v38  ;;  %v978_v38 = vld [vmem:[#allocation2 + $0x4] sm:$0xf] }
 0x469   : > { %v940_v25 = vpop.permute.xlu0 %939 }
 0x46a   : > { %v942_v26 = vadd.f32 %v940_v25, %v934_v15  ;;  %v943_v16 = vadd.f32 %v940_v25, %v935_v1  ;;  %v955_v57 = vrot.slane %v954_v49, 1 }
 0x46c   : > { %v2363_v13 = vmax.f32 %v942_v26, 0.0  ;;  %v2365_v34 = vmax.f32 %v943_v16, 0.0  ;;  %v956_v7 = vadd.f32 %v955_v57, %v954_v49  ;;  %v980_v57 = vld [vmem:[#allocation2 + $0xc] sm:$0xf] }
 0x46e   : > { %v958_v11 = vadd.f32 %v2365_v34, %v2363_v13  ;;  %v957_v15 = vadd.f32 %v956_v7, %v948_v2 }
 0x470   : > { %959 = vadd.xlane.f32.xlu1 %v958_v11 }
 0x4fd   : > { %v960_v39 = vpop.xlane.xlu1 %959 }
 0x4fe   : > { %v961_v40 = vmul.f32 0.00390625, %v960_v39 }
 0x500   : > { %v962_v48 = vmul.f32 %v961_v40, %v947_v6  ;;  %v977_v6 = vld [vmem:[#allocation2] sm:$0xf]  ;;  %v979_v40 = vld [vmem:[#allocation2 + $0x8] sm:$0xf] }
 0x502   : > { %v963_v51 = vsel %vm494_vm0, %v962_v48, 0.0 }
 0x503   : > { %v964_v54 = vrot.slane %v963_v51, 4 }
 0x505   : > { %v965_v58 = vadd.f32 %v964_v54, %v963_v51 }
 0x507   : > { %v966_v60 = vrot.slane %v965_v58, 2 }
 0x509   : > { %v967_v61 = vadd.f32 %v966_v60, %v965_v58 }
 0x50b   : > { %v968_v3 = vrot.slane %v967_v61, 1 }
 0x50d   : > { %v969_v1 = vadd.f32 %v968_v3, %v967_v61  ;;  %v1878_v3 = vmov 10  }
 0x50f   : > { %v970_v25 = vadd.f32 %v969_v1, %v957_v15  ;;  %v1879_v15 = vmov 11   ;;  %v1880_v1 = vmov 13  }
 0x511   : > { %v1579_v26 = vmul.f32 -1.442695, %v970_v25  ;;  %v1881_v25 = vmov 14  }
 0x513   : > { %1750 = vpow2.f32 %v1579_v26  ;;  %v1882_v26 = vmov 9  }
 0x51d   : > { %v1751_v16 = vpop.eup %1750 }
 0x51e   : > { %v974_v11 = vadd.f32 1.0, %v1751_v16  ;;  %v1262_v16 = vld [vmem:[%s2643_s10] sm:$0xf] }
 0x520   : > { %1752 = vrcp.f32 %v974_v11  ;;  %v1883_v11 = vmov 12  }
 0x52a   : > { %v1753_v59 = vpop.eup %1752 }
 0x52b   : > { %986 = vrot.lane.b32.xlu0 %v1753_v59, %s2692_s28  ;;  %1604 = vpush %v1753_v59 }
 0x52f   : > { %993 = vrot.lane.b32.xlu0 %v1753_v59, %s2693_s19 }
 0x533   : > { %1000 = vrot.lane.b32.xlu0 %v1753_v59, %s2694_s15  ;;  %v1884_v59 = vmov 15  }
 0x55c   : > { %s1605_s21 = spop %1604 }
 0x55d   : > { %v983_v39 = vstv %s1605_s21  ;;  %s2699_s21 = smov 113  }
 0x55e   : > { %v985_v51 = vmul.f32 %v983_v39, %v977_v6  ;;  %v1015_v6 = vrot.slane %v2143_v4, %v2097_v52  ;;  %v1019_v39 = vrot.slane %v2145_v0, %v2097_v52 }
 0x59d   : > { %v987_v35 = vpop.permute.xlu0 %986 }
 0x59e   : > { %1606 = vpush %v987_v35 }
 0x5a1   : > { %v994_v36 = vpop.permute.xlu0 %993 }
 0x5a2   : > { %1608 = vpush %v994_v36 }
 0x5a5   : > { %v1001_v37 = vpop.permute.xlu0 %1000 }
 0x5a6   : > { %1610 = vpush %v1001_v37 }
 0x5cf   : > { %s1607_s18 = spop %1606 }
 0x5d0   : > { %v989_v22 = vstv %s1607_s18 }
 0x5d1   : > { %v991_v48 = vmul.f32 %v989_v22, %v978_v38  ;;  %v1029_v38 = vrot.slane %v2143_v4, %v2095_v50  ;;  %v1033_v22 = vrot.slane %v2145_v0, %v2095_v50 }
 0x5d3   : > { %s1609_s4 = spop %1608  ;;  %v992_v58 = vadd.f32 %v991_v48, %v985_v51  ;;  %v1049_v51 = vrot.slane %v2145_v0, %v2099_v53 }
 0x5d4   : > { %v996_v49 = vstv %s1609_s4 }
 0x5d5   : > { %v998_v54 = vmul.f32 %v996_v49, %v979_v40  ;;  %v1045_v49 = vrot.slane %v2143_v4, %v2099_v53 }
 0x5d7   : > { %s1611_s1 = spop %1610  ;;  %v999_v7 = vadd.f32 %v998_v54, %v992_v58 }
 0x5d8   : > { %v1003_v60 = vstv %s1611_s1  ;;  %s2700_s1 = smov 16  }
 0x5d9   : > { %v1005_v61 = vmul.f32 %v1003_v60, %v980_v57 }
 0x5db   : > { %v1006_v2 = vadd.f32 %v1005_v61, %v999_v7 }
 0x5dd   : > { %1055 = vperm.xlu1 %1718, %v1006_v2   ;;  %1009 = vperm.xlu0 %1715, %v1006_v2  }
 0x5e1   : > { %1722 = vset.pattern.permute.xlu1 %v1869_v46  ;;  %1716 = vset.pattern.permute.xlu0 %v1864_v41 }
 0x5e2   : > { %1119 = vperm.xlu1 %1722, %v1006_v2   ;;  %1023 = vperm.xlu0 %1716, %v1006_v2  }
 0x5e6   : > { %1723 = vset.pattern.permute.xlu1 %v1877_v55  ;;  %1717 = vset.pattern.permute.xlu0 %v1865_v42 }
 0x5e7   : > { %1135 = vperm.xlu1 %1723, %v1006_v2   ;;  %1039 = vperm.xlu0 %1717, %v1006_v2  }
 0x5eb   : > { %1725 = vset.pattern.permute.xlu1 %v1878_v3  ;;  %1719 = vset.pattern.permute.xlu0 %v1867_v44 }
 0x5ec   : > { %1167 = vperm.xlu1 %1725, %v1006_v2   ;;  %1071 = vperm.xlu0 %1719, %v1006_v2  }
 0x5f0   : > { %1726 = vset.pattern.permute.xlu1 %v1879_v15  ;;  %1720 = vset.pattern.permute.xlu0 %v1862_v20 }
 0x5f1   : > { %1183 = vperm.xlu1 %1726, %v1006_v2   ;;  %1087 = vperm.xlu0 %1720, %v1006_v2  }
 0x5f5   : > { %1728 = vset.pattern.permute.xlu1 %v1880_v1  ;;  %1721 = vset.pattern.permute.xlu0 %v1868_v45  ;;  %v1061_v1 = vrot.slane %v2143_v4, %v2105_v56 }
 0x5f6   : > { %1215 = vperm.xlu1 %1728, %v1006_v2   ;;  %1103 = vperm.xlu0 %1721, %v1006_v2  }
 0x5fa   : > { %1729 = vset.pattern.permute.xlu1 %v1881_v25  ;;  %1724 = vset.pattern.permute.xlu0 %v1882_v26  ;;  %v1065_v25 = vrot.slane %v2145_v0, %v2105_v56 }
 0x5fb   : > { %1231 = vperm.xlu1 %1729, %v1006_v2   ;;  %1151 = vperm.xlu0 %1724, %v1006_v2  }
 0x5ff   : > { %1727 = vset.pattern.permute.xlu0 %v1883_v11  ;;  %1731 = vset.pattern.permute.xlu1 %v1863_v21 }
 0x600   : > { %1199 = vperm.xlu0 %1727, %v1006_v2   ;;  %1265 = vperm.xlu1 %1731, %v1262_v16  }
 0x604   : > { %1730 = vset.pattern.permute.xlu0 %v1884_v59  ;;  %1738 = vset.pattern.permute.xlu1 %v1868_v45 }
 0x605   : > { %1247 = vperm.xlu0 %1730, %v1006_v2  }
 0x609   : > { %1732 = vset.pattern.permute.xlu0 %v1863_v21 }
 0x65c   : > { %v1010_v35 = vpop.permute.xlu0 %1009  ;;  %v1056_v36 = vpop.permute.xlu1 %1055 }
 0x65d   : > { %v1020_v57 = vmul.f32 %v1015_v6, %v1010_v35  ;;  %v1021_v58 = vmul.f32 %v1019_v39, %v1010_v35  ;;  %v1066_v11 = vmul.f32 %v1061_v1, %v1056_v36  ;;  %v1067_v59 = vmul.f32 %v1065_v25, %v1056_v36 }
 0x65e   : > { %v1081_v35 = vrot.slane %v2145_v0, %v2115_v62 }
 0x661   : > { %v1024_v37 = vpop.permute.xlu0 %1023  ;;  %v1120_v40 = vpop.permute.xlu1 %1119 }
 0x662   : > { %v1034_v45 = vmul.f32 %v1029_v38, %v1024_v37  ;;  %v1035_v48 = vmul.f32 %v1033_v22, %v1024_v37  ;;  %v1077_v37 = vrot.slane %v2143_v4, %v2115_v62  ;;  %v1093_v38 = vrot.slane %v2143_v4, %v2121_v10 }
 0x663   : > { %v1097_v22 = vrot.slane %v2145_v0, %v2121_v10 }
 0x664   : > { %v1036_v61 = vadd.f32 %v1034_v45, %v1020_v57  ;;  %v1037_v2 = vadd.f32 %v1035_v48, %v1021_v58 }
 0x666   : > { %v1040_v54 = vpop.permute.xlu0 %1039  ;;  %v1136_v3 = vpop.permute.xlu1 %1135 }
 0x667   : > { %v1050_v60 = vmul.f32 %v1045_v49, %v1040_v54  ;;  %v1051_v7 = vmul.f32 %v1049_v51, %v1040_v54 }
 0x669   : > { %v1052_v26 = vadd.f32 %v1050_v60, %v1036_v61  ;;  %v1053_v16 = vadd.f32 %v1051_v7, %v1037_v2  ;;  %v1109_v60 = vrot.slane %v2143_v4, %v2127_v19  ;;  %v1113_v7 = vrot.slane %v2145_v0, %v2127_v19 }
 0x66a   : > { %v1125_v61 = vrot.slane %v2143_v4, %v2133_v30  ;;  %v1129_v2 = vrot.slane %v2145_v0, %v2133_v30  ;;  %v1157_v4 = vrot.slane %v2363_v13, %v2095_v50  ;;  %v1161_v0 = vrot.slane %v2365_v34, %v2095_v50 }
 0x66b   : > { %v1072_v15 = vpop.permute.xlu0 %1071  ;;  %v1068_v6 = vadd.f32 %v1066_v11, %v1052_v26  ;;  %v1069_v39 = vadd.f32 %v1067_v59, %v1053_v16  ;;  %v1168_v51 = vpop.permute.xlu1 %1167  ;;  %v1141_v11 = vrot.slane %v2363_v13, %v2097_v52  ;;  %v1145_v59 = vrot.slane %v2365_v34, %v2097_v52 }
 0x66c   : > { %v1082_v45 = vmul.f32 %v1077_v37, %v1072_v15  ;;  %v1083_v48 = vmul.f32 %v1081_v35, %v1072_v15  ;;  %v1130_v35 = vmul.f32 %v1125_v61, %v1120_v40  ;;  %v1173_v52 = vrot.slane %v2363_v13, %v2099_v53 }
 0x66d   : > { %v1193_v50 = vrot.slane %v2365_v34, %v2105_v56 }
 0x66e   : > { %v1084_v57 = vadd.f32 %v1082_v45, %v1068_v6  ;;  %v1085_v58 = vadd.f32 %v1083_v48, %v1069_v39  ;;  %v1146_v39 = vmul.f32 %v1141_v11, %v1136_v3  ;;  %v1147_v45 = vmul.f32 %v1145_v59, %v1136_v3 }
 0x66f   : > { %v1178_v61 = vmul.f32 %v1173_v52, %v1168_v51 }
 0x670   : > { %v1088_v49 = vpop.permute.xlu0 %1087  ;;  %v1184_v37 = vpop.permute.xlu1 %1183 }
 0x671   : > { %v1098_v54 = vmul.f32 %v1093_v38, %v1088_v49  ;;  %v1099_v36 = vmul.f32 %v1097_v22, %v1088_v49  ;;  %v1131_v38 = vmul.f32 %v1129_v2, %v1120_v40  ;;  %v1177_v40 = vrot.slane %v2365_v34, %v2099_v53 }
 0x672   : > { %v1195_v11 = vmul.f32 %v1193_v50, %v1184_v37 }
 0x673   : > { %v1100_v15 = vadd.f32 %v1098_v54, %v1084_v57  ;;  %v1101_v25 = vadd.f32 %v1099_v36, %v1085_v58  ;;  %v1179_v2 = vmul.f32 %v1177_v40, %v1168_v51 }
 0x675   : > { %v1104_v1 = vpop.permute.xlu0 %1103  ;;  %v1216_v3 = vpop.permute.xlu1 %1215 }
 0x676   : > { %v1114_v26 = vmul.f32 %v1109_v60, %v1104_v1  ;;  %v1115_v16 = vmul.f32 %v1113_v7, %v1104_v1  ;;  %v1189_v7 = vrot.slane %v2363_v13, %v2105_v56  ;;  %v1225_v56 = vrot.slane %v2365_v34, %v2121_v10 }
 0x678   : > { %v1116_v22 = vadd.f32 %v1114_v26, %v1100_v15  ;;  %v1117_v6 = vadd.f32 %v1115_v16, %v1101_v25  ;;  %v1205_v25 = vrot.slane %v2363_v13, %v2115_v62  ;;  %v1209_v26 = vrot.slane %v2365_v34, %v2115_v62 }
 0x679   : > { %v1194_v16 = vmul.f32 %v1189_v7, %v1184_v37  ;;  %v1241_v62 = vrot.slane %v2365_v34, %v2127_v19 }
 0x67a   : > { %v1132_v48 = vadd.f32 %v1130_v35, %v1116_v22  ;;  %v1133_v49 = vadd.f32 %v1131_v38, %v1117_v6  ;;  %v1152_v54 = vpop.permute.xlu0 %1151  ;;  %v1221_v38 = vrot.slane %v2363_v13, %v2121_v10  ;;  %v1257_v10 = vrot.slane %v2365_v34, %v2133_v30 }
 0x67b   : > { %v1162_v36 = vmul.f32 %v1157_v4, %v1152_v54  ;;  %v1163_v57 = vmul.f32 %v1161_v0, %v1152_v54  ;;  %v1237_v0 = vrot.slane %v2363_v13, %v2127_v19  ;;  %v1253_v54 = vrot.slane %v2363_v13, %v2133_v30 }
 0x67c   : > { %v1148_v58 = vadd.f32 %v1146_v39, %v1132_v48  ;;  %v1149_v60 = vadd.f32 %v1147_v45, %v1133_v49  ;;  %v1232_v39 = vpop.permute.xlu1 %1231  ;;  %v1226_v37 = vmul.f32 %v1221_v38, %v1216_v3  ;;  %v1227_v45 = vmul.f32 %v1225_v56, %v1216_v3 }
 0x67d   : > { %v1243_v52 = vmul.f32 %v1241_v62, %v1232_v39 }
 0x67e   : > { %v1164_v1 = vadd.f32 %v1162_v36, %v1148_v58  ;;  %v1165_v15 = vadd.f32 %v1163_v57, %v1149_v60  ;;  %v1242_v57 = vmul.f32 %v1237_v0, %v1232_v39 }
 0x67f   : > { %v1200_v53 = vpop.permute.xlu0 %1199 }
 0x680   : > { %v1180_v59 = vadd.f32 %v1178_v61, %v1164_v1  ;;  %v1181_v35 = vadd.f32 %v1179_v2, %v1165_v15  ;;  %v1210_v6 = vmul.f32 %v1205_v25, %v1200_v53  ;;  %v1211_v4 = vmul.f32 %v1209_v26, %v1200_v53  ;;  %v1266_v61 = vpop.permute.xlu1 %1265  ;;  %v1270_v25 = vld [vmem:[%s2644_s11] sm:$0x1f] }
 0x682   : > { %v1196_v51 = vadd.f32 %v1194_v16, %v1180_v59  ;;  %v1197_v22 = vadd.f32 %v1195_v11, %v1181_v35 }
 0x684   : > { %v1212_v48 = vadd.f32 %v1210_v6, %v1196_v51  ;;  %v1213_v49 = vadd.f32 %v1211_v4, %v1197_v22  ;;  %v1248_v36 = vpop.permute.xlu0 %1247 }
 0x685   : > { %v1258_v60 = vmul.f32 %v1253_v54, %v1248_v36  ;;  %v1259_v7 = vmul.f32 %v1257_v10, %v1248_v36  ;;  %v1295_v54 = vld [vmem:[%s2645_s12 + $0x4] sm:$0xf]  ;;  %v1294_v36 = vld [vmem:[%s2645_s12] sm:$0xf] }
 0x686   : > { %v1228_v40 = vadd.f32 %v1226_v37, %v1212_v48  ;;  %v1229_v58 = vadd.f32 %v1227_v45, %v1213_v49 }
 0x688   : > { %v1244_v50 = vadd.f32 %v1242_v57, %v1228_v40  ;;  %v1245_v19 = vadd.f32 %v1243_v52, %v1229_v58  ;;  %v1296_v52 = vld [vmem:[%s2645_s12 + $0x8] sm:$0xf] }
 0x68a   : > { %v1260_v2 = vadd.f32 %v1258_v60, %v1244_v50  ;;  %v1261_v3 = vadd.f32 %v1259_v7, %v1245_v19  ;;  %v1297_v50 = vld [vmem:[%s2645_s12 + $0xc] sm:$0xf] }
 0x68c   : > { %v2461_v1 = vadd.f32 %v1266_v61, %v1260_v2  ;;  %v2463_v15 = vadd.f32 %v1266_v61, %v1261_v3 }
 0x68e   : > { %v1272_v30 = vsel %vm1271_vm9, %v2461_v1, 0.0  ;;  %v1273_v13 = vsel %vm1271_vm9, %v2463_v15, 0.0 }
 0x68f   : > { %v1274_v34 = vadd.f32 %v1273_v13, %v1272_v30 }
 0x691   : > { %1275 = vadd.xlane.f32.xlu1 %v1274_v34 }
 0x6a2   : > { %1325 = vrot.lane.b32.xlu1 %v2461_v1, %s2696_s27 }
 0x6a6   : > { %1356 = vrot.lane.b32.xlu1 %v2461_v1, %s2697_s22 }
 0x6aa   : > { %1358 = vrot.lane.b32.xlu1 %v2463_v15, %s2697_s22 }
 0x6ae   : > { %1372 = vrot.lane.b32.xlu1 %v2461_v1, %s2698_s24 }
 0x6b2   : > { %1374 = vrot.lane.b32.xlu1 %v2463_v15, %s2698_s24  ;;  %s2591_s24 = scalar_lea.hbm %s2647_s14, %s1587_s20 }
 0x6b6   : > { %1396 = vrot.lane.b32.xlu1 %v2461_v1, %s2692_s28 }
 0x6ba   : > { %1414 = vrot.lane.b32.xlu1 %v2463_v15, %s2699_s21 }
 0x6be   : > { %1428 = vrot.lane.b32.xlu1 %v2461_v1, %s2695_s2 }
 0x71e   : > { %v1276_v26 = vpop.xlane.xlu1 %1275 }
 0x71f   : > { %v1277_v53 = vmul.f32 0.00390625, %v1276_v26 }
 0x721   : > { %v1278_v16 = vmul.f32 %v1277_v53, %v1270_v25 }
 0x723   : > { %v1280_v11 = vsel %vm1279_vm10, %v1278_v16, 0.0 }
 0x724   : > { %v1281_v59 = vrot.slane %v1280_v11, 4 }
 0x726   : > { %v1282_v35 = vadd.f32 %v1281_v59, %v1280_v11 }
 0x728   : > { %v1283_v38 = vrot.slane %v1282_v35, 2 }
 0x72a   : > { %v1284_v56 = vadd.f32 %v1283_v38, %v1282_v35 }
 0x72c   : > { %v1285_v51 = vrot.slane %v1284_v56, 1 }
 0x72e   : > { %v1286_v22 = vadd.f32 %v1285_v51, %v1284_v56 }
 0x730   : > { %v1287_v6 = vadd.f32 %v1286_v22, %v1270_v25 }
 0x732   : > { %v1580_v4 = vmul.f32 -1.442695, %v1287_v6 }
 0x734   : > { %1754 = vpow2.f32 %v1580_v4 }
 0x73e   : > { %v1755_v0 = vpop.eup %1754 }
 0x73f   : > { %v1291_v62 = vadd.f32 1.0, %v1755_v0 }
 0x741   : > { %1756 = vrcp.f32 %v1291_v62 }
 0x74b   : > { %v1757_v39 = vpop.eup %1756 }
 0x74c   : > { %v1299_v37 = vrot.slane %v1757_v39, 4 }
 0x74e   : > { %1304 = vrot.lane.b32.xlu0 %v1299_v37, %s2692_s28  ;;  %1612 = vpush %v1299_v37 }
 0x752   : > { %1311 = vrot.lane.b32.xlu0 %v1299_v37, %s2693_s19 }
 0x756   : > { %1318 = vrot.lane.b32.xlu0 %v1299_v37, %s2694_s15 }
 0x75a   : > { %1327 = vrot.lane.b32.xlu0 %v2463_v15, %s2696_s27 }
 0x75e   : > { %1340 = vrot.lane.b32.xlu0 %v2461_v1, %s2700_s1 }
 0x762   : > { %1342 = vrot.lane.b32.xlu0 %v2463_v15, %s2700_s1 }
 0x766   : > { %1398 = vrot.lane.b32.xlu0 %v2463_v15, %s2692_s28 }
 0x76a   : > { %1412 = vrot.lane.b32.xlu0 %v2461_v1, %s2699_s21 }
 0x77f   : > { %s1613_s19 = spop %1612 }
 0x780   : > { %v1301_v57 = vstv %s1613_s19 }
 0x781   : > { %v1303_v60 = vmul.f32 %v1301_v57, %v1294_v36 }
 0x7c0   : > { %v1305_v45 = vpop.permute.xlu0 %1304 }
 0x7c1   : > { %1614 = vpush %v1305_v45 }
 0x7c4   : > { %v1312_v48 = vpop.permute.xlu0 %1311 }
 0x7c5   : > { %1616 = vpush %v1312_v48 }
 0x7c8   : > { %v1319_v49 = vpop.permute.xlu0 %1318 }
 0x7c9   : > { %1618 = vpush %v1319_v49 }
 0x7f2   : > { %s1615_s15 = spop %1614 }
 0x7f3   : > { %v1307_v10 = vstv %s1615_s15 }
 0x7f4   : > { %v1309_v40 = vmul.f32 %v1307_v10, %v1295_v54 }
 0x7f6   : > { %s1617_s21 = spop %1616  ;;  %v1310_v19 = vadd.f32 %v1309_v40, %v1303_v60 }
 0x7f7   : > { %v1314_v58 = vstv %s1617_s21 }
 0x7f8   : > { %v1316_v7 = vmul.f32 %v1314_v58, %v1296_v52 }
 0x7fa   : > { %s1619_s1 = spop %1618  ;;  %v1317_v2 = vadd.f32 %v1316_v7, %v1310_v19 }
 0x7fb   : > { %v1321_v61 = vstv %s1619_s1 }
 0x7fc   : > { %v1323_v3 = vmul.f32 %v1321_v61, %v1297_v50 }
 0x7fe   : > { %v1324_v30 = vadd.f32 %v1323_v3, %v1317_v2 }
 0x800   : > { %1421 = vperm.xlu1 %1738, %v1324_v30   ;;  %1335 = vperm.xlu0 %1732, %v1324_v30  }
 0x804   : > { %1739 = vset.pattern.permute.xlu1 %v1869_v46  ;;  %1733 = vset.pattern.permute.xlu0 %v1864_v41  ;;  %v1460_v41 = vld [vmem:[%s2646_s13] sm:$0xf] }
 0x805   : > { %1437 = vperm.xlu1 %1739, %v1324_v30   ;;  %1349 = vperm.xlu0 %1733, %v1324_v30  }
 0x809   : > { %1430 = vrot.lane.b32.xlu1 %v2463_v15, %s2695_s2  ;;  %1734 = vset.pattern.permute.xlu0 %v1865_v42  ;;  %v1326_v42 = vpop.permute.xlu1 %1325 }
 0x80a   : > { %1365 = vperm.xlu0 %1734, %v1324_v30  }
 0x80d   : > { %1446 = vrot.lane.b32.xlu1 %v2463_v15, %s1876_s3 }
 0x80e   : > { %1735 = vset.pattern.permute.xlu0 %v1866_v43  ;;  %v1357_v43 = vpop.permute.xlu1 %1356 }
 0x80f   : > { %1381 = vperm.xlu0 %1735, %v1324_v30  }
 0x812   : > { %v1359_v46 = vpop.permute.xlu1 %1358 }
 0x813   : > { %1736 = vset.pattern.permute.xlu0 %v1867_v44  ;;  %v1328_v44 = vpop.permute.xlu0 %1327  ;;  %v1360_v22 = vsel %vm782_vm2, %v1357_v43, %v1359_v46  ;;  %v1361_v6 = vsel %vm782_vm2, %v1359_v46, %v1357_v43 }
 0x814   : > { %1389 = vperm.xlu0 %1736, %v1324_v30   ;;  %v1329_v4 = vsel %vm733_vm3, %v1326_v42, %v1328_v44  ;;  %v1330_v0 = vsel %vm733_vm3, %v1328_v44, %v1326_v42  ;;  %v1362_v48 = vmul.f32 %v1361_v6, %v2237_v47  ;;  %v1363_v49 = vmul.f32 %v1360_v22, %v2252_v24 }
 0x815   : > { %v1331_v10 = vmul.f32 %v1330_v0, %v2265_v29  ;;  %v1332_v36 = vmul.f32 %v1329_v4, %v2269_v31 }
 0x817   : > { %v1341_v13 = vpop.permute.xlu0 %1340 }
 0x818   : > { %1737 = vset.pattern.permute.xlu0 %v1862_v20  ;;  %v1373_v20 = vpop.permute.xlu1 %1372 }
 0x819   : > { %1405 = vperm.xlu0 %1737, %v1324_v30  }
 0x81b   : > { %v1343_v34 = vpop.permute.xlu0 %1342 }
 0x81c   : > { %v1375_v25 = vpop.permute.xlu1 %1374  ;;  %v1345_v51 = vsel %vm757_vm1, %v1343_v34, %v1341_v13 }
 0x81d   : > { %1444 = vrot.lane.b32.xlu0 %v2461_v1, %s1876_s3  ;;  %v1376_v62 = vsel %vm807_vm4, %v1373_v20, %v1375_v25  ;;  %v1377_v39 = vsel %vm807_vm4, %v1375_v25, %v1373_v20  ;;  %v1346_v37 = vmul.f32 %v1345_v51, %v2242_v17  ;;  %s473_s3 = sand.u32 1, %s1846_s30  }
 0x81e   : > { %1740 = vset.pattern.permute.xlu0 %v1877_v55  ;;  %v1378_v58 = vmul.f32 %v1377_v39, %v2273_v32  ;;  %v1379_v60 = vmul.f32 %v1376_v62, %v2277_v33  ;;  %s1572_s15 = sshll.u32 %s473_s3, 4  ;;  %s1481_s17 = scalar_lea.sflag [#allocation4], %s473_s3 }
 0x81f   : > { %v1399_v26 = vpop.permute.xlu0 %1398  ;;  %s475_s25 = scalar_lea.vmem [#allocation5], %s1572_s15 }
 0x820   : > { %v1397_v53 = vpop.permute.xlu1 %1396  ;;  %s1495_s27 = sshll.u32 %s475_s25, 4  ;;  %s2593_s27 = int_to_ptr.vmem [resolvable:$true] %s1495_s27 }
 0x821   : > { %1453 = vperm.xlu0 %1740, %v1324_v30   ;;  %v1400_v29 = vsel %vm840_vm5, %v1397_v53, %v1399_v26  ;;  %v1401_v31 = vsel %vm840_vm5, %v1399_v26, %v1397_v53  ;;  %s1788_s21 = scalar_lea.vmem %s2593_s27, 256 }
 0x822   : > { %v1402_v44 = vmul.f32 %v1400_v29, %v2298_v63  ;;  %v1403_v46 = vmul.f32 %v1401_v31, %v2307_v27  ;;  %p1789_p6 = scmp.ne.s32.totalorder %s2593_s27, %s1788_s21 }
 0x823   : > { %v1413_v16 = vpop.permute.xlu0 %1412 }
 0x824   : > { %v1415_v55 = vpop.permute.xlu1 %1414  ;;  %p1790_p10 = pnand %p1789_p6, %p2701_p9 }
 0x825   : > { %1741 = vset.pattern.permute.xlu0 %v1863_v21  ;;  %v1344_v21 = vsel %vm757_vm1, %v1341_v13, %v1343_v34  ;;  %v1416_v32 = vsel %vm865_vm6, %v1413_v16, %v1415_v55  ;;  %v1417_v33 = vsel %vm865_vm6, %v1415_v55, %v1413_v16 }
 0x826   : > { %1463 = vperm.xlu0 %1741, %v1460_v41   ;;  %v1347_v45 = vmul.f32 %v1344_v21, %v2246_v18  ;;  %v1418_v34 = vmul.f32 %v1416_v32, %v2311_v28  ;;  %v1419_v25 = vmul.f32 %v1417_v33, %v2319_v5  ;;  %p1791_p12 = pneg %p1790_p10 }
 0x828   : > { %v1429_v35 = vpop.permute.xlu1 %1428 }
 0x87f   : > { %v1336_v11 = vpop.permute.xlu0 %1335  ;;  %v1422_v38 = vpop.permute.xlu1 %1421 }
 0x880   : > { %v1338_v7 = vmul.f32 %v1336_v11, %v1331_v10  ;;  %v1339_v17 = vmul.f32 %v1336_v11, %v1332_v36  ;;  %v1424_v63 = vmul.f32 %v1422_v38, %v1418_v34  ;;  %v1425_v27 = vmul.f32 %v1422_v38, %v1419_v25 }
 0x884   : > { %v1350_v59 = vpop.permute.xlu0 %1349  ;;  %v1438_v40 = vpop.permute.xlu1 %1437 }
 0x885   : > { %v1352_v57 = vmul.f32 %v1350_v59, %v1346_v37  ;;  %v1353_v52 = vmul.f32 %v1350_v59, %v1347_v45 }
 0x887   : > { %v1354_v19 = vadd.f32 %v1352_v57, %v1338_v7  ;;  %v1355_v47 = vadd.f32 %v1353_v52, %v1339_v17  ;;  %v1759_v17 = vld [vmem:[%s2049_s26 + $0x8] sm:$0xff] }
 0x888   : > { %v1431_v3 = vpop.permute.xlu1 %1430 }
 0x889   : > { %v1366_v56 = vpop.permute.xlu0 %1365  ;;  %v1432_v26 = vsel %vm890_vm7, %v1429_v35, %v1431_v3  ;;  %v1433_v53 = vsel %vm890_vm7, %v1431_v3, %v1429_v35 }
 0x88a   : > { %v1368_v50 = vmul.f32 %v1366_v56, %v1362_v48  ;;  %v1369_v18 = vmul.f32 %v1366_v56, %v1363_v49  ;;  %v1434_v21 = vmul.f32 %v1432_v26, %v2328_v8  ;;  %v1435_v28 = vmul.f32 %v1433_v53, %v2332_v9 }
 0x88c   : > { %v1370_v30 = vadd.f32 %v1368_v50, %v1354_v19  ;;  %v1371_v41 = vadd.f32 %v1369_v18, %v1355_v47  ;;  %v1447_v22 = vpop.permute.xlu1 %1446  ;;  %v1440_v37 = vmul.f32 %v1438_v40, %v1434_v21  ;;  %v1441_v8 = vmul.f32 %v1438_v40, %v1435_v28 }
 0x88e   : > { %v1382_v54 = vpop.permute.xlu0 %1381 }
 0x88f   : > { %v1384_v61 = vmul.f32 %v1382_v54, %v1378_v58  ;;  %v1385_v24 = vmul.f32 %v1382_v54, %v1379_v60  ;;  %v1758_v60 = vld [vmem:[%s2049_s26] sm:$0xff]  ;;  %s1885_s26 = smov [#allocation5]  }
 0x890   : > { %s1792_s18 = sshll.u32 %s1885_s26, 4  ;;  %s1793_s18 = int_to_ptr.vmem [resolvable:$false] %s1792_s18 }
 0x891   : > { %v1386_v13 = vadd.f32 %v1384_v61, %v1370_v30  ;;  %v1387_v20 = vadd.f32 %v1385_v24, %v1371_v41  ;;  %s1794_s4 = scalar_lea.vmem %s1793_s18, 512  ;;  %p1795_p2 = scmp.lt.s32.totalorder %s2593_s27, %s1793_s18 }
 0x892   : > { %p1796_p3 = scmp.lt.s32.totalorder %s1794_s4, %s1788_s21 }
 0x893   : > { %v1390_v2 = vpop.permute.xlu0 %1389 }
 0x894   : > { %v1392_v42 = vmul.f32 %v1390_v2, %v2461_v1  ;;  %v1393_v43 = vmul.f32 %v1390_v2, %v2463_v15  ;;  %p1797_p4 = por %p1796_p3, %p1795_p2 }
 0x896   : > { %v1394_v55 = vadd.f32 %v1392_v42, %v1386_v13  ;;  %v1395_v11 = vadd.f32 %v1393_v43, %v1387_v20  ;;  %p1798_p7 = pnand %p1797_p4, %p1791_p12 }
 0x898   : > { %v1406_v16 = vpop.permute.xlu0 %1405 }
 0x899   : > { %v1408_v59 = vmul.f32 %v1406_v16, %v1402_v44  ;;  %v1409_v56 = vmul.f32 %v1406_v16, %v1403_v46 }
 0x89b   : > { %v1410_v51 = vadd.f32 %v1408_v59, %v1394_v55  ;;  %v1411_v5 = vadd.f32 %v1409_v56, %v1395_v11 }
 0x89c   : > { %v1445_v6 = vpop.permute.xlu0 %1444 }
 0x89d   : > { %v1426_v4 = vadd.f32 %v1424_v63, %v1410_v51  ;;  %v1427_v0 = vadd.f32 %v1425_v27, %v1411_v5  ;;  %v1448_v35 = vsel %vm915_vm8, %v1445_v6, %v1447_v22  ;;  %v1449_v62 = vsel %vm915_vm8, %v1447_v22, %v1445_v6 }
 0x89e   : > { %v1450_v39 = vmul.f32 %v2350_v14, %v1448_v35  ;;  %v1451_v38 = vmul.f32 %v2355_v23, %v1449_v62 }
 0x89f   : > { %v1442_v49 = vadd.f32 %v1440_v37, %v1426_v4  ;;  %v1443_v54 = vadd.f32 %v1441_v8, %v1427_v0 }
 0x8a0   : > { %v1454_v9 = vpop.permute.xlu0 %1453 }
 0x8a1   : > { %v1456_v45 = vmul.f32 %v1454_v9, %v1450_v39  ;;  %v1457_v48 = vmul.f32 %v1454_v9, %v1451_v38 }
 0x8a3   : > { %v1458_v10 = vadd.f32 %v1456_v45, %v1442_v49  ;;  %v1459_v36 = vadd.f32 %v1457_v48, %v1443_v54 }
 0x8a5   : > { %v1464_v12 = vpop.permute.xlu0 %1463 }
 0x8a6   : > { %v1466_v57 = vadd.f32 %v1464_v12, %v1458_v10  ;;  %v1467_v52 = vadd.f32 %v1464_v12, %v1459_v36 }
 0x8a8   : > { %v1470_v14 = vrot.slane %v1466_v57, 4  ;;  %v1471_v58 = vrot.slane %v1467_v52, 4 }
 0x8aa   : > { %v1474_v23 = vsel %vm1271_vm9, %v2461_v1, %v1470_v14  ;;  %v1475_v40 = vsel %vm1271_vm9, %v2463_v15, %v1471_v58 }
 0x8ab   : > { %v1476_v7 = vadd.f32 %v1758_v60, %v1474_v23  ;;  %v1477_v50 = vadd.f32 %v1759_v17, %v1475_v40 }
 0x8ad   : > { %1478 = vst [vmem:[%s475_s25] sm:$0xff] %v1476_v7  ;;  %1479 = vst [vmem:[%s475_s25 + $0x8] sm:$0xff] %v1477_v50 }
 0x8ae   : > { %1801 = shalt.err (!%p1798_p7)
}
 0x8af   : > { %s1802_s1 = scalar_lea.hbm %s2591_s24, 256  ;;  %s1806_s3 = scalar_lea.hbm %s2647_s14, 512 }
 0x8b0   : > { %p1803_p8 = scmp.ne.s32.totalorder %s2591_s24, %s1802_s1  ;;  %p1807_p1 = scmp.lt.u32.totalorder %s2591_s24, %s2647_s14 }
 0x8b1   : > { %p1808_p0 = scmp.lt.u32.totalorder %s1806_s3, %s1802_s1  ;;  %p1810_p6 = scmp.lt.u32.totalorder %s1802_s1, %s2591_s24 }
 0x8b2   : > { %p1804_p11 = pnand %p1803_p8, %p2701_p9 }
 0x8b3   : > { %p1809_p5 = por %p1808_p0, %p1807_p1 }
 0x8b4   : > { %p1805_p13 = pneg %p1804_p11 }
 0x8b5   : > { %p1811_p10 = por %p1810_p6, %p1809_p5 }
 0x8b7   : > { %p1812_p12 = pnand %p1811_p10, %p1805_p13 }
 0x8b9   : > { %1815 = shalt.err (!%p1812_p12)
}
 0x8ba   : > { %1624 = dma.vmem_to_hbm [thread:$0]  (%p2701_p9), %s2593_s27, 256, %s2591_s24, %s1481_s17  }
 0x8bb PF: > { %s2702_s25 = sld [smem:[#allocation11_spill]]  ;;  %p1636_p2 = scmp.ge.s32.totalorder %s1854_s16, 2 }
 0x8bc   : > { %s1507_s22 = sand.u32 1, %s1842_s29  }
 0x8bd   : > { %s1508_s28 = scalar_lea.sflag [#allocation4], %s1507_s22 }
 0x8c1   : > { %p2703_p3 = scmp.ne.s32.totalorder %s2702_s25, 0 }
 0x8c3   : > { %p1631_p4 = pnand %p1636_p2, %p2703_p3 }
 0x8c5   : > { %1837 = dma.done.wait (!%p1631_p4), %s1508_s28, 256  }
 0x8c6   : > { %1839 = vsyncadd (!%p1631_p4), %s1508_s28, 4294967040  ;;  %s2704_s16 = sld [smem:[#allocation9_spill]]  ;;  %s2705_s21 = sld [smem:[#allocation8_spill]] }
 0x8c7   : > { %s2706_s15 = sld [smem:[#allocation10_spill]]  ;;  %s2707_s29 = smov %s1846_s30 }
 0x8cc   : > { %p25_p7 = scmp.ge.s32.totalorder %s2704_s16, 4   ;;  %s2708_s30 = smov %s2705_s21 }
 0x8ce   :  { %27 = sbr.rel (!%p25_p7) target bundleno = 9 (0x9), region = 116 }
 0x8d5   :  { %1513 = vsyncpa [#allocation3], 1 }
 0x8d6   :  { %1515 = vsyncpa [#allocation3 + $0x1], 1 }
 0x8d7   :  { %1516 = vsyncpa [#allocation4], 1 }
 0x8d8   :  { %1518 = vsyncpa [#allocation4 + $0x1], 1 }

</bundles_post_ra>
